<compile_context>
chip_gen: v7x
topology: tpu7x:2x2x1
jax: 0.10.0
libtpu: 0.0.40
codegen_flags: <defaults>
</compile_context>

<pallas_src>
import jax
import jax.numpy as jnp
import numpy as np
from jax.experimental import pallas as pl
from jax.experimental.pallas import tpu as pltpu

EPS = 1e-5  # PyTorch nn.LayerNorm default


def prenorm_kernel(x_ref, g_ref, b_ref, w_ref, wb_ref, o_ref, acc_ref, y_ref):
    # x_ref : (tm, D)        row tile (full D, needed for the LN reduction)
    # g_ref : (1, D)         LayerNorm gamma
    # b_ref : (1, D)         LayerNorm beta
    # w_ref : (tk, tn)       Linear weight tile
    # wb_ref: (1, tn)        Linear bias tile
    # o_ref : (tm, tn)       output tile
    # acc_ref: (tm, tn) f32  matmul accumulator (VMEM scratch)
    # y_ref : (num_k, tm, tk) normalized activations, cached per row tile
    j = pl.program_id(1)
    k = pl.program_id(2)
    num_k, _, tk = y_ref.shape

    # --- LayerNorm: computed once per row tile, stats in f32 (matches PyTorch
    #     biased variance + eps inside the sqrt). Cached in VMEM and reused for
    #     every (j, k) tile of the fused Linear. ---
    @pl.when((j == 0) & (k == 0))
    def _layernorm():
        xf = x_ref[...].astype(jnp.float32)
        mean = jnp.mean(xf, axis=-1, keepdims=True)
        cen = xf - mean
        var = jnp.mean(cen * cen, axis=-1, keepdims=True)
        xhat = cen * jax.lax.rsqrt(var + EPS)
        y = xhat * g_ref[...].astype(jnp.float32) + b_ref[...].astype(jnp.float32)
        # Cast once to the MXU feed dtype (weight dtype); store in K-major
        # chunks so the matmul below only needs a dynamic *leading*-dim index.
        y = y.astype(y_ref.dtype)
        for kc in range(num_k):                       # static slices only
            y_ref[kc] = y[:, kc * tk:(kc + 1) * tk]

    # --- accumulator init on the first K step ---
    @pl.when(k == 0)
    def _zero_acc():
        acc_ref[...] = jnp.zeros_like(acc_ref)

    # --- fused Linear: feed weight in native dtype, accumulate in f32 ---
    acc_ref[...] += jnp.dot(y_ref[k], w_ref[...],
                            preferred_element_type=jnp.float32)

    # --- finalize on the last K step: add bias, cast, store lane-dense tile ---
    @pl.when(k == pl.num_programs(2) - 1)
    def _finalize():
        out = acc_ref[...] + wb_ref[...].astype(jnp.float32)
        o_ref[...] = out.astype(o_ref.dtype)


def _pick_tile(total, want, quantum):
    """Largest t <= want with t % quantum == 0 and total % t == 0, else full dim."""
    if total % quantum == 0:
        t = min(want, total)
        t -= t % quantum
        while t >= quantum:
            if total % t == 0:
                return t
            t -= quantum
    return total


def prenorm(x, gamma, beta, w, wbias, *, tm=256, tn=256, tk=256):
    """x: (B, N, D) -> (B, N, Dout).  LayerNorm(D) then Linear(D, Dout), fused.

    gamma, beta: (D,)   LayerNorm affine params
    w: (D, Dout), wbias: (Dout,)   fused Linear params
    """
    B, N, D = x.shape
    Dout = w.shape[1]
    rows = B * N

    # Row tile: multiple of the sublane quantum for the activation dtype
    # (8 for f32, 16 for bf16, 32 for int8/fp8); don't over-pad tiny inputs.
    row_q = max(8, 32 // x.dtype.itemsize)
    tm = max(row_q, (tm // row_q) * row_q)
    tm = min(tm, ((rows + row_q - 1) // row_q) * row_q)
    rows_p = ((rows + tm - 1) // tm) * tm        # pad rows to a tile multiple

    # Lane-dense (multiple-of-128) tiles for the contraction and output dims,
    # falling back to the full dimension when it isn't 128-aligned.
    tk = _pick_tile(D, tk, 128)
    tn = _pick_tile(Dout, tn, 128)
    num_k = D // tk

    x2 = x.reshape(rows, D)
    if rows_p != rows:
        x2 = jnp.pad(x2, ((0, rows_p - rows), (0, 0)))
    gamma2 = gamma.reshape(1, D)
    beta2 = beta.reshape(1, D)
    wbias2 = wbias.reshape(1, Dout)

    # Explicit VMEM budget (double-buffered pipelined blocks + scratch).
    itx, itw = x.dtype.itemsize, w.dtype.itemsize
    vmem_est = (
        2 * tm * D * itx                       # x row tile
        + 2 * 2 * D * gamma2.dtype.itemsize    # gamma + beta
        + 2 * tk * tn * itw                    # weight tile
        + 2 * tn * wbias2.dtype.itemsize       # bias tile
        + 2 * tm * tn * itx                    # output tile
        + tm * tn * 4                          # f32 accumulator
        + num_k * tm * tk * itw                # cached normalized activations
    )
    vmem_limit = int(min(max(2 * vmem_est, 32 * 1024 * 1024), 96 * 1024 * 1024))

    grid = (rows_p // tm, Dout // tn, num_k)   # reduction axis last

    out2 = pl.pallas_call(
        prenorm_kernel,
        out_shape=jax.ShapeDtypeStruct((rows_p, Dout), x.dtype),
        grid_spec=pltpu.PrefetchScalarGridSpec(
            num_scalar_prefetch=0,
            grid=grid,
            in_specs=[
                pl.BlockSpec((tm, D), lambda i, j, k: (i, 0)),   # x rows (full D)
                pl.BlockSpec((1, D), lambda i, j, k: (0, 0)),    # gamma
                pl.BlockSpec((1, D), lambda i, j, k: (0, 0)),    # beta
                pl.BlockSpec((tk, tn), lambda i, j, k: (k, j)),  # W tile
                pl.BlockSpec((1, tn), lambda i, j, k: (0, j)),   # W bias tile
            ],
            out_specs=pl.BlockSpec((tm, tn), lambda i, j, k: (i, j)),
            scratch_shapes=[
                pltpu.VMEM((tm, tn), jnp.float32),         # matmul accumulator
                pltpu.VMEM((num_k, tm, tk), w.dtype),      # cached LN output
            ],
        ),
        compiler_params=pltpu.CompilerParams(
            dimension_semantics=("parallel", "arbitrary", "arbitrary"),
            vmem_limit_bytes=vmem_limit,
        ),
    )(x2, gamma2, beta2, w, wbias2)

    return out2[:rows].reshape(B, N, Dout)


def prenorm_ref(x, gamma, beta, w, wbias):
    xf = x.astype(jnp.float32)
    mean = jnp.mean(xf, axis=-1, keepdims=True)
    var = jnp.mean((xf - mean) ** 2, axis=-1, keepdims=True)
    y = (xf - mean) / jnp.sqrt(var + EPS) * gamma + beta
    out = jnp.einsum("bnd,de->bne", y, w.astype(jnp.float32)) + wbias
    return out.astype(x.dtype)


if __name__ == "__main__":
    # Small but lane-dense shapes: batch=2, seq=72 (non-multiple of the row
    # tile, exercises padding), hidden=512 (exercises Dout and K tiling).
    B, N, D = 2, 72, 512
    Dout = D

    key = jax.random.PRNGKey(0)
    kx, kw, kb, kg, kbt = jax.random.split(key, 5)

    x = jax.random.normal(kx, (B, N, D), dtype=jnp.float32)

    # Deterministic synthetic parameters (no checkpoint load).
    gamma = 1.0 + 0.1 * jax.random.normal(kg, (D,), dtype=jnp.float32)
    beta = 0.05 * jax.random.normal(kbt, (D,), dtype=jnp.float32)
    w = jax.random.normal(kw, (D, Dout), dtype=jnp.float32) * 0.02
    wbias = jax.random.normal(kb, (Dout,), dtype=jnp.float32) * 0.02

    out = prenorm(x, gamma, beta, w, wbias)
    jax.block_until_ready(out)

    ref = prenorm_ref(x, gamma, beta, w, wbias)
    np.testing.assert_allclose(np.asarray(out), np.asarray(ref),
                               rtol=1e-4, atol=1e-4)
    print("KERNEL_OK")
</pallas_src>

<mosaic_0001>
module attributes {stable_mosaic.version = 11 : i64} {
  func.func @prenorm_kernel(%arg0: i32, %arg1: i32, %arg2: i32, %arg3: memref<144x512xf32, #tpu.memory_space<vmem>>, %arg4: memref<1x512xf32, #tpu.memory_space<vmem>>, %arg5: memref<1x512xf32, #tpu.memory_space<vmem>>, %arg6: memref<256x256xf32, #tpu.memory_space<vmem>>, %arg7: memref<1x256xf32, #tpu.memory_space<vmem>>, %arg8: memref<144x256xf32, #tpu.memory_space<vmem>>, %arg9: memref<144x256xf32, #tpu.memory_space<vmem>>, %arg10: memref<2x144x256xf32, #tpu.memory_space<vmem>>) attributes {dimension_semantics = [#tpu.dimension_semantics<parallel>, #tpu.dimension_semantics<arbitrary>, #tpu.dimension_semantics<arbitrary>], iteration_bounds = array<i64: 1, 2, 2>, scalar_prefetch = 0 : i64, scratch_operands = 2 : i64, tpu.core_type = #tpu.core_type<tc>, window_params = [{transform_indices = @transform_0, window_bounds = array<i64: 144, 512>}, {pipeline_mode = #tpu.pipeline_mode<synchronous>, transform_indices = @transform_1, window_bounds = array<i64: 1, 512>}, {pipeline_mode = #tpu.pipeline_mode<synchronous>, transform_indices = @transform_2, window_bounds = array<i64: 1, 512>}, {transform_indices = @transform_3, window_bounds = array<i64: 256, 256>}, {transform_indices = @transform_4, window_bounds = array<i64: 1, 256>}, {transform_indices = @transform_5, window_bounds = array<i64: 144, 256>}]} {
    %c0_i32 = arith.constant 0 : i32
    %0 = arith.cmpi eq, %arg1, %c0_i32 : i32
    %c0_i32_0 = arith.constant 0 : i32
    %1 = arith.cmpi eq, %arg2, %c0_i32_0 : i32
    %2 = arith.andi %0, %1 : i1
    %3 = arith.extui %2 : i1 to i32
    %c0_i32_1 = arith.constant 0 : i32
    %4 = arith.cmpi ne, %3, %c0_i32_1 : i32
    scf.if %4 {
      %c0_12 = arith.constant 0 : index
      %c0_13 = arith.constant 0 : index
      %19 = vector.load %arg3[%c0_12, %c0_13] : memref<144x512xf32, #tpu.memory_space<vmem>>, vector<144x512xf32>
      %cst_14 = arith.constant dense<0.000000e+00> : vector<144xf32>
      %20 = vector.multi_reduction <add>, %19, %cst_14 [1] : vector<144x512xf32> to vector<144xf32>
      %21 = vector.shape_cast %20 : vector<144xf32> to vector<144x1xf32>
      %cst_15 = arith.constant 5.120000e+02 : f32
      %22 = vector.broadcast %cst_15 : f32 to vector<144x1xf32>
      %23 = arith.divf %21, %22 : vector<144x1xf32>
      %24 = vector.broadcast %23 : vector<144x1xf32> to vector<144x512xf32>
      %25 = arith.subf %19, %24 : vector<144x512xf32>
      %26 = arith.mulf %25, %25 : vector<144x512xf32>
      %cst_16 = arith.constant dense<0.000000e+00> : vector<144xf32>
      %27 = vector.multi_reduction <add>, %26, %cst_16 [1] : vector<144x512xf32> to vector<144xf32>
      %28 = vector.shape_cast %27 : vector<144xf32> to vector<144x1xf32>
      %cst_17 = arith.constant 5.120000e+02 : f32
      %29 = vector.broadcast %cst_17 : f32 to vector<144x1xf32>
      %30 = arith.divf %28, %29 : vector<144x1xf32>
      %cst_18 = arith.constant 9.99999974E-6 : f32
      %31 = vector.broadcast %cst_18 : f32 to vector<144x1xf32>
      %32 = arith.addf %30, %31 : vector<144x1xf32>
      %33 = math.rsqrt %32 : vector<144x1xf32>
      %34 = vector.broadcast %33 : vector<144x1xf32> to vector<144x512xf32>
      %35 = arith.mulf %25, %34 : vector<144x512xf32>
      %c0_19 = arith.constant 0 : index
      %c0_20 = arith.constant 0 : index
      %36 = vector.load %arg4[%c0_19, %c0_20] : memref<1x512xf32, #tpu.memory_space<vmem>>, vector<1x512xf32>
      %37 = vector.broadcast %36 : vector<1x512xf32> to vector<144x512xf32>
      %38 = arith.mulf %35, %37 : vector<144x512xf32>
      %c0_21 = arith.constant 0 : index
      %c0_22 = arith.constant 0 : index
      %39 = vector.load %arg5[%c0_21, %c0_22] : memref<1x512xf32, #tpu.memory_space<vmem>>, vector<1x512xf32>
      %40 = vector.broadcast %39 : vector<1x512xf32> to vector<144x512xf32>
      %41 = arith.addf %38, %40 : vector<144x512xf32>
      %42 = vector.extract_strided_slice %41 {offsets = [0, 0], sizes = [144, 256], strides = [1, 1]} : vector<144x512xf32> to vector<144x256xf32>
      %c0_23 = arith.constant 0 : index
      %c0_24 = arith.constant 0 : index
      %c0_25 = arith.constant 0 : index
      %43 = vector.load %arg10[%c0_23, %c0_24, %c0_25] : memref<2x144x256xf32, #tpu.memory_space<vmem>>, vector<1x144x256xf32>
      %44 = vector.shape_cast %43 : vector<1x144x256xf32> to vector<144x256xf32>
      %45 = vector.shape_cast %42 : vector<144x256xf32> to vector<1x144x256xf32>
      tpu.vector_store %arg10[%c0_23, %c0_24, %c0_25], %45 {strides = array<i32>} : memref<2x144x256xf32, #tpu.memory_space<vmem>>, vector<1x144x256xf32>,
      %46 = vector.extract_strided_slice %41 {offsets = [0, 256], sizes = [144, 256], strides = [1, 1]} : vector<144x512xf32> to vector<144x256xf32>
      %c1 = arith.constant 1 : index
      %c0_26 = arith.constant 0 : index
      %c0_27 = arith.constant 0 : index
      %47 = vector.load %arg10[%c1, %c0_26, %c0_27] : memref<2x144x256xf32, #tpu.memory_space<vmem>>, vector<1x144x256xf32>
      %48 = vector.shape_cast %47 : vector<1x144x256xf32> to vector<144x256xf32>
      %49 = vector.shape_cast %46 : vector<144x256xf32> to vector<1x144x256xf32>
      tpu.vector_store %arg10[%c1, %c0_26, %c0_27], %49 {strides = array<i32>} : memref<2x144x256xf32, #tpu.memory_space<vmem>>, vector<1x144x256xf32>,
    } else {
    }
    %c0_i32_2 = arith.constant 0 : i32
    %5 = arith.cmpi eq, %arg2, %c0_i32_2 : i32
    %6 = arith.extui %5 : i1 to i32
    %c0_i32_3 = arith.constant 0 : i32
    %7 = arith.cmpi ne, %6, %c0_i32_3 : i32
    scf.if %7 {
      %cst_12 = arith.constant 0.000000e+00 : f32
      %19 = vector.broadcast %cst_12 : f32 to vector<144x256xf32>
      %c0_13 = arith.constant 0 : index
      %c0_14 = arith.constant 0 : index
      %20 = vector.load %arg9[%c0_13, %c0_14] : memref<144x256xf32, #tpu.memory_space<vmem>>, vector<144x256xf32>
      tpu.vector_store %arg9[%c0_13, %c0_14], %19 {strides = array<i32>} : memref<144x256xf32, #tpu.memory_space<vmem>>, vector<144x256xf32>,
    } else {
    }
    %c0 = arith.constant 0 : index
    %c0_4 = arith.constant 0 : index
    %8 = vector.load %arg9[%c0, %c0_4] : memref<144x256xf32, #tpu.memory_space<vmem>>, vector<144x256xf32>
    %9 = arith.index_cast %arg2 : i32 to index
    %c0_5 = arith.constant 0 : index
    %c0_6 = arith.constant 0 : index
    %10 = vector.load %arg10[%9, %c0_5, %c0_6] : memref<2x144x256xf32, #tpu.memory_space<vmem>>, vector<1x144x256xf32>
    %11 = vector.shape_cast %10 : vector<1x144x256xf32> to vector<144x256xf32>
    %c0_7 = arith.constant 0 : index
    %c0_8 = arith.constant 0 : index
    %12 = vector.load %arg6[%c0_7, %c0_8] : memref<256x256xf32, #tpu.memory_space<vmem>>, vector<256x256xf32>
    %cst = arith.constant dense<0.000000e+00> : vector<144x256xf32>
    %13 = tpu.matmul %11, %12, %cst {dimension_numbers = #tpu.dot_dimension_numbers<[1], [0], [0], [1], [0, 0, 1, 1], [], []>} : vector<144x256xf32>, vector<256x256xf32>, vector<144x256xf32> -> vector<144x256xf32>
    %14 = arith.addf %8, %13 : vector<144x256xf32>
    %c0_9 = arith.constant 0 : index
    %c0_10 = arith.constant 0 : index
    %15 = vector.load %arg9[%c0_9, %c0_10] : memref<144x256xf32, #tpu.memory_space<vmem>>, vector<144x256xf32>
    tpu.vector_store %arg9[%c0_9, %c0_10], %14 {strides = array<i32>} : memref<144x256xf32, #tpu.memory_space<vmem>>, vector<144x256xf32>,
    %c1_i32 = arith.constant 1 : i32
    %16 = arith.cmpi eq, %arg2, %c1_i32 : i32
    %17 = arith.extui %16 : i1 to i32
    %c0_i32_11 = arith.constant 0 : i32
    %18 = arith.cmpi ne, %17, %c0_i32_11 : i32
    scf.if %18 {
      %c0_12 = arith.constant 0 : index
      %c0_13 = arith.constant 0 : index
      %19 = vector.load %arg9[%c0_12, %c0_13] : memref<144x256xf32, #tpu.memory_space<vmem>>, vector<144x256xf32>
      %c0_14 = arith.constant 0 : index
      %c0_15 = arith.constant 0 : index
      %20 = vector.load %arg7[%c0_14, %c0_15] : memref<1x256xf32, #tpu.memory_space<vmem>>, vector<1x256xf32>
      %21 = vector.broadcast %20 : vector<1x256xf32> to vector<144x256xf32>
      %22 = arith.addf %19, %21 : vector<144x256xf32>
      %c0_16 = arith.constant 0 : index
      %c0_17 = arith.constant 0 : index
      %23 = vector.load %arg8[%c0_16, %c0_17] : memref<144x256xf32, #tpu.memory_space<vmem>>, vector<144x256xf32>
      tpu.vector_store %arg8[%c0_16, %c0_17], %22 {strides = array<i32>} : memref<144x256xf32, #tpu.memory_space<vmem>>, vector<144x256xf32>,
    } else {
    }
    return
  }
  func.func @transform_0(%arg0: i32, %arg1: i32, %arg2: i32) -> (i32, i32) {
    %c0_i32 = arith.constant 0 : i32
    %c0_i32_0 = arith.constant 0 : i32
    return %arg0, %c0_i32 : i32, i32
  }
  func.func @transform_1(%arg0: i32, %arg1: i32, %arg2: i32) -> (i32, i32) {
    %c0_i32 = arith.constant 0 : i32
    %c0_i32_0 = arith.constant 0 : i32
    %c0_i32_1 = arith.constant 0 : i32
    return %c0_i32, %c0_i32_0 : i32, i32
  }
  func.func @transform_2(%arg0: i32, %arg1: i32, %arg2: i32) -> (i32, i32) {
    %c0_i32 = arith.constant 0 : i32
    %c0_i32_0 = arith.constant 0 : i32
    %c0_i32_1 = arith.constant 0 : i32
    return %c0_i32, %c0_i32_0 : i32, i32
  }
  func.func @transform_3(%arg0: i32, %arg1: i32, %arg2: i32) -> (i32, i32) {
    %c0_i32 = arith.constant 0 : i32
    return %arg2, %arg1 : i32, i32
  }
  func.func @transform_4(%arg0: i32, %arg1: i32, %arg2: i32) -> (i32, i32) {
    %c0_i32 = arith.constant 0 : i32
    %c0_i32_0 = arith.constant 0 : i32
    return %c0_i32, %arg1 : i32, i32
  }
  func.func @transform_5(%arg0: i32, %arg1: i32, %arg2: i32) -> (i32, i32) {
    %c0_i32 = arith.constant 0 : i32
    return %arg0, %arg1 : i32, i32
  }
}

</mosaic_0001>

<bundles_post_ra>
// kernel: tpu_custom_call.1
= control target key start
LH: loop header
LB: loop body
LE: loop exit
PB: predicated region body
PF: predicated region fallthrough
CT: control target
= control target key end

     0   :  { %s3798_s0 = inlined_call_operand.hbm [shape: f32[144,512], index: 0, kind: input, shape index: {}]   ;;  %s3799_s1 = inlined_call_operand.hbm [shape: f32[1,512], index: 1, kind: input, shape index: {}]   ;;  %s3800_s2 = inlined_call_operand.vmem [shape: f32[1,512], index: 2, kind: input, shape index: {}]   ;;  %s3801_s3 = inlined_call_operand.hbm [shape: f32[512,512], index: 3, kind: input, shape index: {}]   ;;  %s3802_s4 = inlined_call_operand.vmem [shape: f32[1,512], index: 4, kind: input, shape index: {}]   ;;  %s3803_s5 = inlined_call_operand.hbm [shape: f32[144,512], index: 5, kind: output, shape index: {}]  }
   0x1   :  { %3875 = sst [smem:[#allocation63_spill]] %s3798_s0 }
   0x2   :  { %3876 = sst [smem:[#allocation64_spill]] %s3799_s1 }
   0x3   :  { %3877 = sst [smem:[#allocation65_spill]] %s3800_s2 }
   0x4   :  { %3878 = sst [smem:[#allocation66_spill]] %s3802_s4 }
   0x5   :  { %3879 = sst [smem:[#allocation67_spill]] %s3803_s5 }
   0x6   :  { %10 = vsyncpa [#allocation5], 0 }
   0x7   :  { %11 = vsyncpa [#allocation8], 0 }
   0x8   :  { %12 = vsyncpa [#allocation6], 0 }
   0x9   :  { %14 = vsyncpa [#allocation6 + $0x1], 0  ;;  %s2374_s18 = smov 0   ;;  %s2376_s19 = smov 0  }
   0xa   :  { %s2378_s20 = smov 0   ;;  %s2380_s21 = smov 0  }
   0xb   :  { %s2382_s22 = smov 0   ;;  %s2384_s23 = smov 0  }
   0xc   :  { %s2386_s24 = smov 0   ;;  %s2388_s25 = smov 0  }
   0xd   :  { %s2390_s26 = smov 0   ;;  %s2392_s27 = smov 0  }
   0xe   :  { %s2394_s28 = smov 0  }
   0xf LB: > { %3880 = sst [smem:[#allocation15_spill]] %s2290_s18  ;;  %s2428_s29 = sadd.s32 4294967295, %s2330_s28   ;;  %s2330_s28 = sphi %s2394_s28, %s20_s28   ;;  %s2326_s27 = sphi %s2392_s27, %s4038_s27   ;;  %s2322_s26 = sphi %s2390_s26, %s4030_s26   ;;  %s2318_s25 = sphi %s2388_s25, %s4037_s25   ;;  %s2314_s24 = sphi %s2386_s24, %s4029_s24   ;;  %s2310_s23 = sphi %s2384_s23, %s4036_s23   ;;  %s2306_s22 = sphi %s2382_s22, %s4035_s22   ;;  %s2302_s21 = sphi %s2380_s21, %s4034_s21   ;;  %s2298_s20 = sphi %s2378_s20, %s4033_s20   ;;  %s2294_s19 = sphi %s2376_s19, %s4032_s19   ;;  %s2290_s18 = sphi %s2374_s18, %s4031_s18  }
  0x10   : > { %3881 = sst [smem:[#allocation16_spill]] %s2322_s26  ;;  %s1825_s30 = sadd.s32 4294967294, %s2330_s28  }
  0x11   : > { %3882 = sst [smem:[#allocation17_spill]] %s2330_s28  ;;  %p123_p0 = scmp.ne.s32.totalorder %s2310_s23, %s2306_s22 }
  0x12   : > { %p124_p1 = scmp.eq.s32.totalorder %s2330_s28, 0  ;;  %p129_p2 = scmp.ne.s32.totalorder %s2306_s22, %s2302_s21 }
  0x13   : > { %p3806_p3 = scmp.eq.s32.totalorder %s2428_s29, 0  ;;  %p180_p5 = scmp.ne.s32.totalorder %s2298_s20, %s2294_s19 }
  0x14   : > { %p2438_p4 = por %p124_p1, %p123_p0  ;;  %p181_p7 = scmp.eq.s32.totalorder %s2428_s29, 3 }
  0x15   : > { %p2446_p6 = por %p3806_p3, %p129_p2  ;;  %p186_p8 = scmp.ne.s32.totalorder %s2294_s19, %s2290_s18 }
  0x16   : > { %p187_p9 = scmp.eq.s32.totalorder %s1825_s30, 3  ;;  %p2453_p10 = por %p181_p7, %p180_p5 }
  0x17   : > { %s3884_s9 = scalar_select %p2446_p6, 1, 0 }
  0x18   : > { %s3885_s10 = scalar_select %p2453_p10, 1, 0 }
  0x19   : > { %p1826_p11 = scmp.ge.s32.totalorder %s2330_s28, 1  ;;  %p2458_p12 = por %p187_p9, %p186_p8 }
  0x1a   : > { %3886 = sst [smem:[#allocation18_spill]] %s3885_s10  ;;  %p194_p13 = scmp.lt.s32.totalorder %s2330_s28, 5 }
  0x1b   : > { %s3887_s11 = scalar_select %p2458_p12, 1, 0 }
  0x1c   : > { %p2463_p0 = pnand %p1826_p11, %p194_p13  ;;  %s2332_s13 = smov [#allocation4]  }
  0x1d   : > { %3888 = sst [smem:[#allocation19_spill]] %s3887_s11  ;;  %s210_s14 = sshll.u32 %s2332_s13, 4  ;;  %s2467_s14 = int_to_ptr.vmem [resolvable:$true] %s210_s14 }
  0x1e   : > { %p1959_p1 = pneg %p2463_p0  ;;  %p1976_p2 = scmp.lt.s32.totalorder %s2330_s28, 4 }
  0x1f   : > { %s2333_s17 = smov [#allocation7]   ;;  %s3892_s0 = sld [smem:[#allocation63_spill]] }
  0x20   : > { %p2474_p5 = pnand %p1959_p1, %p3806_p3  ;;  %p2480_p7 = pnand %p1976_p2, %p2438_p4 }
  0x21   : > { %s224_s21 = sshll.u32 %s2333_s17, 4  ;;  %s2484_s21 = int_to_ptr.vmem [resolvable:$true] %s224_s21 }
  0x22   : > { %p2116_p9 = pneg %p2474_p5 }
  0x25   : > { %s2114_s6 = scalar_lea.hbm %s3892_s0, 9216 }
  0x26   : > { %p2115_p8 = scmp.ne.s32.totalorder %s3892_s0, %s2114_s6  ;;  %p2121_p13 = scmp.lt.u32.totalorder %s2114_s6, %s3892_s0 }
  0x28   : > { %p2117_p4 = pnand %p2116_p9, %p2115_p8 }
  0x2a   : > { %p2118_p11 = pneg %p2117_p4 }
  0x2c   : > { %p2123_p1 = pnand %p2121_p13, %p2118_p11 }
  0x2e   : > { %2126 = shalt.err (!%p2123_p1)
}
  0x2f   : > { %s2127_s17 = scalar_lea.vmem %s2467_s14, 9216  ;;  %p2135_p10 = scmp.lt.s32.totalorder %s2467_s14, %s2467_s14 }
  0x30   : > { %p2128_p2 = scmp.ne.s32.totalorder %s2467_s14, %s2127_s17  ;;  %p2136_p8 = scmp.lt.s32.totalorder %s2127_s17, %s2127_s17 }
  0x32   : > { %p2130_p3 = pnand %p2128_p2, %p2116_p9  ;;  %p2137_p4 = por %p2136_p8, %p2135_p10 }
  0x34   : > { %p2131_p12 = pneg %p2130_p3 }
  0x36   : > { %p2138_p6 = pnand %p2137_p4, %p2131_p12 }
  0x38   : > { %2141 = shalt.err (!%p2138_p6)
}
  0x39   : > { %s3812_s18 = smov 512   ;;  %s2335_s6 = smov 32  }
  0x3a   : > { %1962 = dma.hbm_to_vmem [thread:$0]  (!%p2474_p5), %s3892_s0, 9216, %s2467_s14, [#allocation5], %s3812_s18, %s3812_s18, %s2335_s6  }
  0x3b   : > { %s3893_s1 = sld [smem:[#allocation64_spill]] }
  0x41   : > { %s2142_s8 = scalar_lea.hbm %s3893_s1, 64 }
  0x42   : > { %p2143_p3 = scmp.ne.s32.totalorder %s3893_s1, %s2142_s8  ;;  %p2149_p12 = scmp.lt.u32.totalorder %s2142_s8, %s3893_s1 }
  0x44   : > { %p2145_p6 = pnand %p2143_p3, %p2116_p9 }
  0x46   : > { %p2146_p10 = pneg %p2145_p6 }
  0x48   : > { %p2151_p11 = pnand %p2149_p12, %p2146_p10 }
  0x4a   : > { %2154 = shalt.err (!%p2151_p11)
}
  0x4b   : > { %s2155_s14 = scalar_lea.vmem %s2484_s21, 64  ;;  %p2163_p8 = scmp.lt.s32.totalorder %s2484_s21, %s2484_s21 }
  0x4c   : > { %p2156_p13 = scmp.ne.s32.totalorder %s2484_s21, %s2155_s14  ;;  %p2164_p4 = scmp.lt.s32.totalorder %s2155_s14, %s2155_s14 }
  0x4e   : > { %p2158_p1 = pnand %p2156_p13, %p2116_p9  ;;  %p2165_p3 = por %p2164_p4, %p2163_p8 }
  0x50   : > { %p2159_p2 = pneg %p2158_p1 }
  0x52   : > { %p2166_p6 = pnand %p2165_p3, %p2159_p2 }
  0x54   : > { %2169 = shalt.err (!%p2166_p6)
}
  0x55   : > { %1965 = dma.hbm_to_vmem [thread:$0]  (!%p2474_p5), %s3893_s1, 64, %s2484_s21, [#allocation8]  }
  0x56   : > { %s32_s10 = sadd.s32 1, %s2322_s26  ;;  %s35_s6 = sadd.s32 1, %s2326_s27 }
  0x57   : > { %p33_p9 = scmp.ge.s32.totalorder %s32_s10, 2  ;;  %s238_s7 = sand.u32 1, %s2330_s28  }
  0x58   : > { %s240_s11 = sand.u32 1, %s2310_s23   ;;  %s1832_s13 = sshll.u32 %s2326_s27, 1 }
  0x59   : > { %s4040_s10 = smov (%p33_p9, %s32_s10), 0  ;;  %s4042_s6 = smov (!%p33_p9, %s35_s6), %s2326_s27 }
  0x5a   : > { %3894 = sst [smem:[#allocation20_spill]] %s4040_s10  ;;  %s111_s15 = ssub.s32 %s2322_s26, %s4040_s10 }
  0x5b   : > { %p37_p10 = scmp.ge.s32.totalorder %s4042_s6, 2  ;;  %s1830_s30 = sshll.u32 %s240_s11, 9 }
  0x5c   : > { %s1847_s21 = sshll.u32 %s2322_s26, 7  ;;  %s242_s8 = scalar_lea.vmem [#allocation9], %s1830_s30 }
  0x5d   : > { %s4044_s6 = smov (%p37_p10, %s4042_s6), 0  ;;  %s252_s17 = sshll.u32 %s242_s8, 4  ;;  %s2570_s17 = int_to_ptr.vmem [resolvable:$true] %s252_s17 }
  0x5e   : > { %s112_s14 = ssub.s32 %s2326_s27, %s4044_s6  ;;  %s249_s2 = sadd.s32 %s1847_s21, %s1832_s13 }
  0x5f   : > { %s113_s5 = sor.u32 %s112_s14, %s111_s15  ;;  %p168_p5 = scmp.eq.s32.totalorder %s112_s14, 0 }
  0x60   : > { %p114_p12 = scmp.eq.s32.totalorder %s113_s5, 0  ;;  %s1834_s18 = sshll.u32 %s249_s2, 7 }
  0x61   : > { %s3895_s0 = sadd.s32 1, %s2298_s20  ;;  %s3896_s10 = sadd.s32 1, %s2310_s23 }
  0x62   : > { %s2558_s1 = scalar_select %p168_p5, %s2298_s20, %s3895_s0  }
  0x63   : > { %s2563_s11 = scalar_select %p114_p12, %s2310_s23, %s3896_s10  }
  0x64   : > { %s2568_s26 = scalar_lea.hbm %s3801_s3, %s1834_s18  ;;  %s2572_s15 = scalar_lea.sflag [#allocation5], %s238_s7 }
  0x65   : > { %s2170_s30 = scalar_lea.hbm %s2568_s26, 8192  ;;  %p2172_p13 = pneg %p2480_p7 }
  0x66   : > { %p2171_p11 = scmp.ne.s32.totalorder %s2568_s26, %s2170_s30  ;;  %s2175_s28 = scalar_lea.hbm %s3801_s3, 32768 }
  0x67   : > { %p2176_p8 = scmp.lt.u32.totalorder %s2568_s26, %s3801_s3  ;;  %p2177_p4 = scmp.lt.u32.totalorder %s2175_s28, %s2170_s30 }
  0x68   : > { %p2173_p1 = pnand %p2172_p13, %p2171_p11  ;;  %p2179_p6 = scmp.lt.u32.totalorder %s2170_s30, %s2568_s26 }
  0x69   : > { %p2178_p3 = por %p2177_p4, %p2176_p8 }
  0x6a   : > { %p2174_p2 = pneg %p2173_p1 }
  0x6b   : > { %p2180_p9 = por %p2179_p6, %p2178_p3 }
  0x6d   : > { %p2181_p10 = pnand %p2180_p9, %p2174_p2 }
  0x6f   : > { %2184 = shalt.err (!%p2181_p10)
}
  0x70   : > { %s2185_s7 = scalar_lea.vmem %s2570_s17, 8192  ;;  %s2336_s13 = smov [#allocation9]  }
  0x71   : > { %p2186_p5 = scmp.ne.s32.totalorder %s2570_s17, %s2185_s7  ;;  %s2190_s21 = sshll.u32 %s2336_s13, 4  ;;  %s2191_s21 = int_to_ptr.vmem [resolvable:$false] %s2190_s21 }
  0x72   : > { %s2192_s8 = scalar_lea.vmem %s2191_s21, 16384  ;;  %p2193_p1 = scmp.lt.s32.totalorder %s2570_s17, %s2191_s21 }
  0x73   : > { %p2188_p12 = pnand %p2186_p5, %p2172_p13  ;;  %p2194_p8 = scmp.lt.s32.totalorder %s2192_s8, %s2185_s7 }
  0x75   : > { %p2189_p11 = pneg %p2188_p12  ;;  %p2195_p4 = por %p2194_p8, %p2193_p1 }
  0x77   : > { %p2196_p3 = pnand %p2195_p4, %p2189_p11 }
  0x79   : > { %2199 = shalt.err (!%p2196_p3)
}
  0x7a   : > { %s2337_s14 = smov 256   ;;  %s2338_s2 = smov 16  }
  0x7b   : > { %s3897_s5 = smov 512   ;;  %272 = sbr.rel (%p2463_p0) target bundleno = 928 (0x3a0), region = 40 }
  0x7c   : > { %1969 = dma.hbm_to_vmem [thread:$0]  (!%p2480_p7), %s2568_s26, 8192, %s2570_s17, %s2572_s15, %s3897_s5, %s2337_s14, %s2338_s2  }
  0x7d   : > { %p3898_p13 = scmp.eq.s32.totalorder (!%p2463_p0), %s2428_s29, 0 }
  0x82   : > { %2273 = dma.done.wait (%p3898_p13), [#allocation5], 9216   ;;  %p3899_p2 = pmov %p3898_p13 }
  0x84   : > { %2275 = vsyncadd (%p3899_p2), [#allocation5], 4294958080  ;;  %p3900_p6 = pmov %p3899_p2 }
  0x85   : > { %p3901_p9 = pmov %p3899_p2 }
  0x86   : > { %2277 = dma.done.wait (%p3900_p6), [#allocation8], 64  }
  0x87   : > { %2279 = vsyncadd (%p3901_p9), [#allocation8], 4294967232  ;;  %s282_s16 = sand.u32 1, %s2428_s29   ;;  %s284_s26 = sand.u32 1, %s2306_s22  }
  0x88   : > { %s1838_s17 = sshll.u32 %s284_s26, 9  ;;  %s283_s12 = scalar_lea.sflag [#allocation5], %s282_s16 }
  0x89   : > { %s2613_s15 = scalar_lea.vmem [#allocation9], %s1838_s17  ;;  %p3902_p0 = scmp.ne.s32.totalorder %s3884_s9, 0 }
  0x8b   : > { %2281 = dma.done.wait (%p3902_p0), %s283_s12, 8192  }
  0x8c   : > { %2283 = vsyncadd (%p3902_p0), %s283_s12, 4294959104  ;;  %s314_s30 = sand.u32 1, %s2294_s19   ;;  %s1839_s0 = sshll.u32 %s2318_s25, 1 }
  0x8d   : > { %s1946_s4 = smul.u32 288, %s314_s30  ;;  %p321_p7 = scmp.lt.s32.totalorder %s1839_s0, 3 }
  0x8e   : > { %p327_p10 = scmp.eq.s32.totalorder %s2318_s25, 0  ;;  %p328_p5 = scmp.eq.s32.totalorder %s2314_s24, 0 }
  0x8f   : > { %s4046_s0 = smov (!%p321_p7, %s1839_s0), 3  ;;  %s3903_s9 = sld [smem:[#allocation66_spill]] }
  0x90   : > { %p329_p12 = pnand %p328_p5, %p327_p10  ;;  %s2631_s10 = scalar_lea.vmem [#allocation10], %s1946_s4 }
  0x92   : > { %332 = sbr.rel (%p329_p12) target bundleno = 551 (0x227), region = 56 }
  0x95   : > { %s323_s18 = scalar_lea.vmem %s3903_s9, %s4046_s0 }
  0x99   : > { %v2633_v0 = vld [vmem:[#allocation4 + $0x40] sm:$0xff]  ;;  %v2635_v1 = vld [vmem:[#allocation4 + $0x48] sm:$0xff]  ;;  %v2637_v2 = vld [vmem:[#allocation4 + $0x50] sm:$0xff]  ;;  %s3984_s21 = sld [smem:[#allocation65_spill]] }
  0x9a   : > { %v415_v3 = vadd.f32 %v2635_v1, %v2633_v0  ;;  %v2641_v4 = vld [vmem:[#allocation4] sm:$0xff]  ;;  %v2643_v5 = vld [vmem:[#allocation4 + $0x8] sm:$0xff]  ;;  %v2645_v6 = vld [vmem:[#allocation4 + $0x58] sm:$0xff] }
  0x9b   : > { %v2647_v7 = vld [vmem:[#allocation4 + $0x10] sm:$0xff]  ;;  %v405_v8 = vadd.f32 %v2643_v5, %v2641_v4  ;;  %v2651_v9 = vld [vmem:[#allocation4 + $0x60] sm:$0xff]  ;;  %v2654_v11 = vld [vmem:[#allocation4 + $0x18] sm:$0xff] }
  0x9c   : > { %v416_v10 = vadd.f32 %v415_v3, %v2637_v2  ;;  %v2656_v12 = vld [vmem:[#allocation4 + $0x68] sm:$0xff]  ;;  %v2658_v13 = vld [vmem:[#allocation4 + $0x70] sm:$0xff]  ;;  %v2663_v16 = vld [vmem:[#allocation4 + $0x20] sm:$0xff] }
  0x9d   : > { %v406_v14 = vadd.f32 %v405_v8, %v2647_v7  ;;  %v420_v15 = vadd.f32 %v2656_v12, %v2651_v9  ;;  %v2665_v17 = vld [vmem:[#allocation4 + $0x28] sm:$0xff]  ;;  %v2667_v18 = vld [vmem:[#allocation4 + $0x30] sm:$0xff]  ;;  %v2670_v20 = vld [vmem:[#allocation4 + $0x78] sm:$0xff] }
  0x9e   : > { %v417_v19 = vadd.f32 %v416_v10, %v2645_v6  ;;  %v410_v21 = vadd.f32 %v2665_v17, %v2663_v16  ;;  %v2674_v22 = vld [vmem:[#allocation4 + $0xa0] sm:$0xff]  ;;  %v2676_v23 = vld [vmem:[#allocation4 + $0xa8] sm:$0xff]  ;;  %v2680_v26 = vld [vmem:[#allocation4 + $0x38] sm:$0xff] }
  0x9f   : > { %v407_v24 = vadd.f32 %v406_v14, %v2654_v11  ;;  %v421_v25 = vadd.f32 %v420_v15, %v2658_v13  ;;  %v2682_v27 = vld [vmem:[#allocation4 + $0xb0] sm:$0xff]  ;;  %v430_v28 = vadd.f32 %v2676_v23, %v2674_v22  ;;  %v2686_v29 = vld [vmem:[#allocation4 + $0x80] sm:$0xff]  ;;  %v2689_v31 = vld [vmem:[#allocation4 + $0xb8] sm:$0xff] }
  0xa0   : > { %418 = vadd.xlane.f32.xlu1 %v417_v19  ;;  %v411_v30 = vadd.f32 %v410_v21, %v2667_v18  ;;  %v2691_v32 = vld [vmem:[#allocation4 + $0x88] sm:$0xff]  ;;  %v2693_v33 = vld [vmem:[#allocation4 + $0x90] sm:$0xff]  ;;  %v2699_v37 = vld [vmem:[#allocation4 + $0xe0] sm:$0xff] }
  0xa1   : > { %408 = vadd.xlane.f32.xlu0 %v407_v24  ;;  %v422_v34 = vadd.f32 %v421_v25, %v2670_v20  ;;  %v431_v35 = vadd.f32 %v430_v28, %v2682_v27  ;;  %v425_v36 = vadd.f32 %v2691_v32, %v2686_v29  ;;  %v2701_v38 = vld [vmem:[#allocation4 + $0xe8] sm:$0xff]  ;;  %v2703_v39 = vld [vmem:[#allocation4 + $0xf0] sm:$0xff]  ;;  %v2706_v41 = vld [vmem:[#allocation4 + $0x98] sm:$0xff] }
  0xa2   : > { %v412_v40 = vadd.f32 %v411_v30, %v2680_v26  ;;  %v440_v42 = vadd.f32 %v2701_v38, %v2699_v37  ;;  %v2710_v43 = vld [vmem:[#allocation4 + $0xc0] sm:$0xff]  ;;  %v2712_v44 = vld [vmem:[#allocation4 + $0xc8] sm:$0xff]  ;;  %v2715_v46 = vld [vmem:[#allocation4 + $0xd0] sm:$0xff] }
  0xa3   : > { %v426_v45 = vadd.f32 %v425_v36, %v2693_v33  ;;  %v435_v47 = vadd.f32 %v2712_v44, %v2710_v43  ;;  %v2719_v48 = vld [vmem:[#allocation4 + $0x120] sm:$0xff]  ;;  %v432_v49 = vadd.f32 %v431_v35, %v2689_v31  ;;  %v2722_v50 = vld [vmem:[#allocation4 + $0xf8] sm:$0xff]  ;;  %v2727_v53 = vld [vmem:[#allocation4 + $0x128] sm:$0xff] }
  0xa4   : > { %423 = vadd.xlane.f32.xlu1 %v422_v34  ;;  %3904 = vst [vmem:[#allocation21_spill] sm:$0xff] %v2722_v50  ;;  %v441_v51 = vadd.f32 %v440_v42, %v2703_v39  ;;  %v2725_v52 = vld [vmem:[#allocation4 + $0xd8] sm:$0xff]  ;;  %v2731_v56 = vld [vmem:[#allocation4 + $0x130] sm:$0xff]  ;;  %v450_v57 = vadd.f32 %v2727_v53, %v2719_v48  ;;  %v2735_v58 = vld [vmem:[#allocation4 + $0x100] sm:$0xff] }
  0xa5   : > { %413 = vadd.xlane.f32.xlu0 %v412_v40  ;;  %v427_v54 = vadd.f32 %v426_v45, %v2706_v41  ;;  %v436_v55 = vadd.f32 %v435_v47, %v2715_v46  ;;  %3905 = vst [vmem:[#allocation22_spill] sm:$0xff] %v2731_v56  ;;  %v2737_v59 = vld [vmem:[#allocation4 + $0x108] sm:$0xff]  ;;  %v2739_v60 = vld [vmem:[#allocation4 + $0x110] sm:$0xff]  ;;  %v2743_v62 = vld [vmem:[#allocation4 + $0x160] sm:$0xff] }
  0xa6   : > { %3906 = vst [vmem:[#allocation23_spill] sm:$0xff] %v2739_v60  ;;  %v445_v61 = vadd.f32 %v2737_v59, %v2735_v58  ;;  %v2745_v63 = vld [vmem:[#allocation4 + $0x168] sm:$0xff]  ;;  %v2747_v3 = vld [vmem:[#allocation4 + $0x140] sm:$0xff]  ;;  %v442_v8 = vadd.f32 %v441_v51, %v2722_v50  ;;  %v2750_v10 = vld [vmem:[#allocation4 + $0x138] sm:$0xff]  ;;  %v451_v14 = vadd.f32 %v450_v57, %v2731_v56 }
  0xa7   : > { %3907 = vst [vmem:[#allocation24_spill] sm:$0xff] %v2750_v10  ;;  %v2753_v15 = vld [vmem:[#allocation4 + $0x118] sm:$0xff]  ;;  %v460_v19 = vadd.f32 %v2745_v63, %v2743_v62  ;;  %v2757_v21 = vld [vmem:[#allocation4 + $0x148] sm:$0xff]  ;;  %v437_v24 = vadd.f32 %v436_v55, %v2725_v52  ;;  %v2761_v28 = vld [vmem:[#allocation4 + $0x170] sm:$0xff] }
  0xa8   : > { %433 = vadd.xlane.f32.xlu1 %v432_v49  ;;  %3908 = vst [vmem:[#allocation25_spill] sm:$0xff] %v2753_v15  ;;  %v446_v25 = vadd.f32 %v445_v61, %v2739_v60  ;;  %3909 = vst [vmem:[#allocation26_spill] sm:$0xff] %v2761_v28  ;;  %v455_v30 = vadd.f32 %v2757_v21, %v2747_v3  ;;  %v2765_v34 = vld [vmem:[#allocation4 + $0x1a0] sm:$0xff]  ;;  %v2767_v35 = vld [vmem:[#allocation4 + $0x1a8] sm:$0xff]  ;;  %v452_v45 = vadd.f32 %v451_v14, %v2750_v10 }
  0xa9   : > { %428 = vadd.xlane.f32.xlu0 %v427_v54  ;;  %v2769_v36 = vld [vmem:[#allocation4 + $0x150] sm:$0xff]  ;;  %v2771_v40 = vld [vmem:[#allocation4 + $0x180] sm:$0xff]  ;;  %v2773_v42 = vld [vmem:[#allocation4 + $0x188] sm:$0xff]  ;;  %v461_v49 = vadd.f32 %v460_v19, %v2761_v28  ;;  %v470_v54 = vadd.f32 %v2767_v35, %v2765_v34 }
  0xaa   : > { %3910 = vst [vmem:[#allocation27_spill] sm:$0xff] %v2769_v36  ;;  %3911 = vst [vmem:[#allocation28_spill] sm:$0xff] %v2771_v40  ;;  %v2776_v47 = vld [vmem:[#allocation4 + $0x178] sm:$0xff]  ;;  %v447_v55 = vadd.f32 %v446_v25, %v2753_v15  ;;  %v456_v57 = vadd.f32 %v455_v30, %v2769_v36  ;;  %v2785_v61 = vld [vmem:[#allocation4 + $0x1b0] sm:$0xff] }
  0xab   : > { %3912 = vst [vmem:[#allocation29_spill] sm:$0xff] %v2773_v42  ;;  %3913 = vst [vmem:[#allocation30_spill] sm:$0xff] %v2776_v47  ;;  %v2779_v51 = vld [vmem:[#allocation4 + $0x158] sm:$0xff]  ;;  %v2789_v14 = vld [vmem:[#allocation4 + $0x1e0] sm:$0xff]  ;;  %v471_v30 = vadd.f32 %v470_v54, %v2785_v61 }
  0xac   : > { %443 = vadd.xlane.f32.xlu1 %v442_v8  ;;  %3914 = vst [vmem:[#allocation31_spill] sm:$0xff] %v2779_v51  ;;  %3915 = vst [vmem:[#allocation32_spill] sm:$0xff] %v2785_v61  ;;  %v465_v8 = vadd.f32 %v2773_v42, %v2771_v40  ;;  %v2791_v10 = vld [vmem:[#allocation4 + $0x1e8] sm:$0xff]  ;;  %v2793_v19 = vld [vmem:[#allocation4 + $0x190] sm:$0xff]  ;;  %v457_v60 = vadd.f32 %v456_v57, %v2779_v51 }
  0xad   : > { %438 = vadd.xlane.f32.xlu0 %v437_v24  ;;  %3916 = vst [vmem:[#allocation33_spill] sm:$0xff] %v2791_v10  ;;  %3917 = vst [vmem:[#allocation34_spill] sm:$0xff] %v2793_v19  ;;  %v2795_v28 = vld [vmem:[#allocation4 + $0x1c0] sm:$0xff]  ;;  %v2797_v56 = vld [vmem:[#allocation4 + $0x1c8] sm:$0xff]  ;;  %v462_v24 = vadd.f32 %v461_v49, %v2776_v47  ;;  %v480_v15 = vadd.f32 %v2791_v10, %v2789_v14 }
  0xae   : > { %3918 = vst [vmem:[#allocation35_spill] sm:$0xff] %v2795_v28  ;;  %3919 = vst [vmem:[#allocation36_spill] sm:$0xff] %v2797_v56  ;;  %v2800_v25 = vld [vmem:[#allocation4 + $0x1b8] sm:$0xff]  ;;  %v466_v50 = vadd.f32 %v465_v8, %v2793_v19  ;;  %v2809_v42 = vld [vmem:[#allocation4 + $0x1f0] sm:$0xff] }
  0xaf   : > { %3920 = vst [vmem:[#allocation37_spill] sm:$0xff] %v2800_v25  ;;  %v2803_v36 = vld [vmem:[#allocation4 + $0x198] sm:$0xff]  ;;  %3922 = vst [vmem:[#allocation39_spill] sm:$0xff] %v2809_v42  ;;  %v2813_v49 = vld [vmem:[#allocation4 + $0x220] sm:$0xff]  ;;  %v481_v57 = vadd.f32 %v480_v15, %v2809_v42 }
  0xb0   : > { %453 = vadd.xlane.f32.xlu1 %v452_v45  ;;  %3921 = vst [vmem:[#allocation38_spill] sm:$0xff] %v2803_v36  ;;  %v475_v45 = vadd.f32 %v2797_v56, %v2795_v28  ;;  %v2815_v47 = vld [vmem:[#allocation4 + $0x228] sm:$0xff]  ;;  %v2817_v54 = vld [vmem:[#allocation4 + $0x1d0] sm:$0xff]  ;;  %v2819_v61 = vld [vmem:[#allocation4 + $0x200] sm:$0xff]  ;;  %v467_v19 = vadd.f32 %v466_v50, %v2803_v36 }
  0xb1   : > { %448 = vadd.xlane.f32.xlu0 %v447_v55  ;;  %3923 = vst [vmem:[#allocation40_spill] sm:$0xff] %v2817_v54  ;;  %v2821_v40 = vld [vmem:[#allocation4 + $0x208] sm:$0xff]  ;;  %v472_v55 = vadd.f32 %v471_v30, %v2800_v25  ;;  %v490_v8 = vadd.f32 %v2815_v47, %v2813_v49  ;;  %v2828_v51 = vld [vmem:[#allocation4 + $0x1f8] sm:$0xff]  ;;  %v2831_v28 = vld [vmem:[#allocation4 + $0x230] sm:$0xff] }
  0xb2   : > { %v476_v56 = vadd.f32 %v475_v45, %v2817_v54  ;;  %3924 = vst [vmem:[#allocation41_spill] sm:$0xff] %v2831_v28  ;;  %v485_v10 = vadd.f32 %v2821_v40, %v2819_v61  ;;  %v2837_v30 = vld [vmem:[#allocation4 + $0x210] sm:$0xff]  ;;  %v482_v15 = vadd.f32 %v481_v57, %v2828_v51  ;;  %v2842_v42 = vld [vmem:[#allocation4 + $0x238] sm:$0xff] }
  0xb3   : > { %3925 = vst [vmem:[#allocation42_spill] sm:$0xff] %v2842_v42  ;;  %v2845_v54 = vld [vmem:[#allocation4 + $0x218] sm:$0xff] }
  0xb4   : > { %463 = vadd.xlane.f32.xlu1 %v462_v24  ;;  %v2835_v24 = vld [vmem:[#allocation4 + $0x1d8] sm:$0xff]  ;;  %v486_v45 = vadd.f32 %v485_v10, %v2837_v30 }
  0xb5   : > { %458 = vadd.xlane.f32.xlu0 %v457_v60  ;;  %v491_v60 = vadd.f32 %v490_v8, %v2831_v28  ;;  %v477_v50 = vadd.f32 %v476_v56, %v2835_v24 }
  0xb6   : > { %v487_v36 = vadd.f32 %v486_v45, %v2845_v54 }
  0xb7   : > { %v492_v25 = vadd.f32 %v491_v60, %v2842_v42 }
  0xb8   : > { %473 = vadd.xlane.f32.xlu1 %v472_v55 }
  0xb9   : > { %468 = vadd.xlane.f32.xlu0 %v467_v19 }
  0xbc   : > { %483 = vadd.xlane.f32.xlu1 %v482_v15 }
  0xbd   : > { %478 = vadd.xlane.f32.xlu0 %v477_v50 }
  0xc0   : > { %493 = vadd.xlane.f32.xlu1 %v492_v25 }
  0xc1   : > { %488 = vadd.xlane.f32.xlu0 %v487_v36 }
 0x12d   : > { %v419_v55 = vpop.xlane.xlu1 %418 }
 0x12e   : > { %v498_v57 = vmul.f32 0.001953125, %v419_v55  ;;  %v409_v8 = vpop.xlane.xlu0 %408 }
 0x12f   : > { %v496_v19 = vmul.f32 0.001953125, %v409_v8 }
 0x130   : > { %v2850_v56 = vsub.f32 %v2633_v0, %v498_v57  ;;  %v2853_v28 = vsub.f32 %v2635_v1, %v498_v57  ;;  %v2856_v10 = vsub.f32 %v2637_v2, %v498_v57  ;;  %v2859_v15 = vsub.f32 %v2645_v6, %v498_v57 }
 0x131   : > { %v2862_v60 = vsub.f32 %v2641_v4, %v496_v19  ;;  %v2865_v36 = vsub.f32 %v2643_v5, %v496_v19  ;;  %v424_v25 = vpop.xlane.xlu1 %423  ;;  %v2868_v50 = vsub.f32 %v2647_v7, %v496_v19  ;;  %v2871_v0 = vsub.f32 %v2654_v11, %v496_v19 }
 0x132   : > { %3926 = vst [vmem:[#allocation43_spill] sm:$0xff] %v2850_v56  ;;  %3927 = vst [vmem:[#allocation44_spill] sm:$0xff] %v2853_v28  ;;  %v499_v1 = vmul.f32 0.001953125, %v424_v25  ;;  %v414_v45 = vpop.xlane.xlu0 %413  ;;  %v594_v2 = vmul.f32 %v2850_v56, %v2850_v56  ;;  %v595_v6 = vmul.f32 %v2853_v28, %v2853_v28  ;;  %v596_v4 = vmul.f32 %v2856_v10, %v2856_v10 }
 0x133   : > { %3928 = vst [vmem:[#allocation45_spill] sm:$0xff] %v2856_v10  ;;  %3929 = vst [vmem:[#allocation46_spill] sm:$0xff] %v2859_v15  ;;  %v497_v5 = vmul.f32 0.001953125, %v414_v45  ;;  %v586_v55 = vmul.f32 %v2862_v60, %v2862_v60  ;;  %v587_v7 = vmul.f32 %v2865_v36, %v2865_v36  ;;  %v588_v11 = vmul.f32 %v2868_v50, %v2868_v50 }
 0x134   : > { %3930 = vst [vmem:[#allocation47_spill] sm:$0xff] %v2862_v60  ;;  %3931 = vst [vmem:[#allocation48_spill] sm:$0xff] %v2865_v36  ;;  %v2886_v57 = vsub.f32 %v2651_v9, %v499_v1  ;;  %v2889_v8 = vsub.f32 %v2656_v12, %v499_v1  ;;  %v589_v19 = vmul.f32 %v2871_v0, %v2871_v0 }
 0x135   : > { %3932 = vst [vmem:[#allocation49_spill] sm:$0xff] %v2868_v50  ;;  %3933 = vst [vmem:[#allocation50_spill] sm:$0xff] %v2871_v0  ;;  %v597_v25 = vmul.f32 %v2859_v15, %v2859_v15  ;;  %v2896_v45 = vsub.f32 %v2663_v16, %v497_v5  ;;  %v2899_v10 = vsub.f32 %v2665_v17, %v497_v5  ;;  %v434_v28 = vpop.xlane.xlu1 %433 }
 0x136   : > { %v658_v56 = vadd.f32 %v587_v7, %v586_v55  ;;  %v668_v50 = vadd.f32 %v595_v6, %v594_v2  ;;  %v501_v9 = vmul.f32 0.001953125, %v434_v28  ;;  %v429_v36 = vpop.xlane.xlu0 %428  ;;  %v2902_v12 = vsub.f32 %v2667_v18, %v497_v5 }
 0x137   : > { %v2905_v60 = vsub.f32 %v2680_v26, %v497_v5  ;;  %v2908_v0 = vsub.f32 %v2658_v13, %v499_v1  ;;  %v500_v15 = vmul.f32 0.001953125, %v429_v36  ;;  %v590_v17 = vmul.f32 %v2896_v45, %v2896_v45 }
 0x138   : > { %v659_v16 = vadd.f32 %v658_v56, %v588_v11  ;;  %v669_v42 = vadd.f32 %v668_v50, %v596_v4  ;;  %v2913_v55 = vsub.f32 %v2674_v22, %v501_v9  ;;  %v2916_v28 = vsub.f32 %v2676_v23, %v501_v9 }
 0x139   : > { %v591_v18 = vmul.f32 %v2899_v10, %v2899_v10  ;;  %v592_v26 = vmul.f32 %v2902_v12, %v2902_v12  ;;  %v2923_v13 = vsub.f32 %v2686_v29, %v500_v15  ;;  %v2926_v56 = vsub.f32 %v2691_v32, %v500_v15  ;;  %v444_v36 = vpop.xlane.xlu1 %443 }
 0x13a   : > { %v660_v50 = vadd.f32 %v659_v16, %v589_v19  ;;  %v670_v2 = vadd.f32 %v669_v42, %v597_v25  ;;  %v2928_v22 = vmul.f32 0.001953125, %v444_v36  ;;  %v439_v6 = vpop.xlane.xlu0 %438  ;;  %v593_v23 = vmul.f32 %v2905_v60, %v2905_v60 }
 0x13b   : > { %v663_v4 = vadd.f32 %v591_v18, %v590_v17  ;;  %v2933_v5 = vsub.f32 %v2670_v20, %v499_v1  ;;  %v502_v7 = vmul.f32 0.001953125, %v439_v6  ;;  %v598_v29 = vmul.f32 %v2886_v57, %v2886_v57 }
 0x13c   : > { %661 = vadd.xlane.f32.xlu0 %v660_v50  ;;  %v599_v32 = vmul.f32 %v2889_v8, %v2889_v8  ;;  %v600_v42 = vmul.f32 %v2908_v0, %v2908_v0  ;;  %v2943_v11 = vsub.f32 %v2699_v37, %v2928_v22  ;;  %v2947_v19 = vsub.f32 %v2701_v38, %v2928_v22 }
 0x13d   : > { %v664_v20 = vadd.f32 %v663_v4, %v592_v26  ;;  %v601_v1 = vmul.f32 %v2933_v5, %v2933_v5  ;;  %v2952_v25 = vsub.f32 %v2710_v43, %v502_v7  ;;  %v2955_v16 = vsub.f32 %v2712_v44, %v502_v7  ;;  %v454_v17 = vpop.xlane.xlu1 %453 }
 0x13e   : > { %3934 = vst [vmem:[#allocation51_spill] sm:$0xff] %v2943_v11  ;;  %3935 = vst [vmem:[#allocation52_spill] sm:$0xff] %v2947_v19  ;;  %v673_v18 = vadd.f32 %v599_v32, %v598_v29  ;;  %v2958_v36 = vsub.f32 %v2693_v33, %v500_v15  ;;  %v2960_v37 = vmul.f32 0.001953125, %v454_v17  ;;  %v449_v50 = vpop.xlane.xlu0 %448  ;;  %v2963_v26 = vsub.f32 %v2706_v41, %v500_v15 }
 0x13f   : > { %3936 = vst [vmem:[#allocation53_spill] sm:$0xff] %v2952_v25  ;;  %3937 = vst [vmem:[#allocation54_spill] sm:$0xff] %v2955_v16  ;;  %v665_v38 = vadd.f32 %v664_v20, %v593_v23  ;;  %v602_v6 = vmul.f32 %v2923_v13, %v2923_v13  ;;  %v504_v43 = vmul.f32 0.001953125, %v449_v50  ;;  %v603_v44 = vmul.f32 %v2926_v56, %v2926_v56 }
 0x140   : > { %671 = vadd.xlane.f32.xlu0 %v670_v2  ;;  %v674_v4 = vadd.f32 %v673_v18, %v600_v42  ;;  %v604_v33 = vmul.f32 %v2958_v36, %v2958_v36  ;;  %v2973_v29 = vsub.f32 %v2719_v48, %v2960_v37  ;;  %v2977_v41 = vsub.f32 %v2727_v53, %v2960_v37 }
 0x141   : > { %666 = vadd.xlane.f32.xlu1 %v665_v38  ;;  %v605_v15 = vmul.f32 %v2963_v26, %v2963_v26  ;;  %v2982_v2 = vsub.f32 %v2682_v27, %v501_v9  ;;  %v2985_v23 = vsub.f32 %v2735_v58, %v504_v43  ;;  %v2988_v32 = vsub.f32 %v2737_v59, %v504_v43  ;;  %v464_v42 = vpop.xlane.xlu1 %463 }
 0x142   : > { %3938 = vst [vmem:[#allocation55_spill] sm:$0xff] %v2977_v41  ;;  %v675_v48 = vadd.f32 %v674_v4, %v601_v1  ;;  %v678_v20 = vadd.f32 %v603_v44, %v602_v6  ;;  %v2990_v17 = vmul.f32 0.001953125, %v464_v42  ;;  %v459_v53 = vpop.xlane.xlu0 %458  ;;  %v2993_v18 = vsub.f32 %v2689_v31, %v501_v9 }
 0x143   : > { %3939 = vst [vmem:[#allocation56_spill] sm:$0xff] %v2985_v23  ;;  %3940 = vst [vmem:[#allocation57_spill] sm:$0xff] %v2988_v32  ;;  %v606_v50 = vmul.f32 %v2913_v55, %v2913_v55  ;;  %v607_v27 = vmul.f32 %v2916_v28, %v2916_v28  ;;  %v2999_v58 = vmul.f32 0.001953125, %v459_v53  ;;  %v608_v59 = vmul.f32 %v2982_v2, %v2982_v2 }
 0x144   : > { %v679_v38 = vadd.f32 %v678_v20, %v604_v33  ;;  %v3004_v1 = vsub.f32 %v2715_v46, %v502_v7  ;;  %v3008_v6 = vsub.f32 %v2743_v62, %v2990_v17  ;;  %v3012_v31 = vsub.f32 %v2745_v63, %v2990_v17 }
 0x145   : > { %676 = vadd.xlane.f32.xlu1 %v675_v48  ;;  %v609_v9 = vmul.f32 %v2993_v18, %v2993_v18  ;;  %v683_v4 = vadd.f32 %v607_v27, %v606_v50  ;;  %v3018_v44 = vsub.f32 %v2747_v3, %v2999_v58  ;;  %v3022_v46 = vsub.f32 %v2757_v21, %v2999_v58  ;;  %v474_v62 = vpop.xlane.xlu1 %473 }
 0x146   : > { %3941 = vst [vmem:[#allocation58_spill] sm:$0xff] %v3004_v1  ;;  %3942 = vst [vmem:[#allocation59_spill] sm:$0xff] %v3012_v31  ;;  %v680_v33 = vadd.f32 %v679_v38, %v605_v15  ;;  %v3025_v42 = vsub.f32 %v2725_v52, %v502_v7  ;;  %v3027_v63 = vmul.f32 0.001953125, %v474_v62  ;;  %v469_v48 = vpop.xlane.xlu0 %468  ;;  %v610_v53 = vmul.f32 %v2952_v25, %v2952_v25  ;;  %v3947_v62 = vld [vmem:[#allocation29_spill] sm:$0xff] }
 0x147   : > { %3943 = vst [vmem:[#allocation60_spill] sm:$0xff] %v3022_v46  ;;  %v684_v20 = vadd.f32 %v683_v4, %v608_v59  ;;  %v611_v3 = vmul.f32 %v2955_v16, %v2955_v16  ;;  %v3033_v50 = vmul.f32 0.001953125, %v469_v48  ;;  %v612_v21 = vmul.f32 %v3004_v1, %v3004_v1  ;;  %v3946_v4 = vld [vmem:[#allocation28_spill] sm:$0xff] }
 0x148   : > { %3944 = vst [vmem:[#allocation61_spill] sm:$0xff] %v3025_v42  ;;  %681 = vadd.xlane.f32.xlu0 %v680_v33  ;;  %v613_v52 = vmul.f32 %v3025_v42, %v3025_v42  ;;  %v3041_v7 = vsub.f32 %v2703_v39, %v2928_v22  ;;  %v3045_v15 = vsub.f32 %v2765_v34, %v3027_v63  ;;  %v3948_v42 = vld [vmem:[#allocation21_spill] sm:$0xff] }
 0x149   : > { %v3049_v27 = vsub.f32 %v2767_v35, %v3027_v63  ;;  %v685_v38 = vadd.f32 %v684_v20, %v609_v9  ;;  %v688_v59 = vadd.f32 %v611_v3, %v610_v53  ;;  %v3053_v33 = vsub.f32 %v3946_v4, %v3033_v50  ;;  %v484_v39 = vpop.xlane.xlu1 %483 }
 0x14a   : > { %3945 = vst [vmem:[#allocation62_spill] sm:$0xff] %v3041_v7  ;;  %v3057_v48 = vsub.f32 %v3947_v62, %v3033_v50  ;;  %v3061_v1 = vsub.f32 %v3948_v42, %v2928_v22  ;;  %v614_v34 = vmul.f32 %v2943_v11, %v2943_v11  ;;  %v3065_v9 = vmul.f32 0.001953125, %v484_v39  ;;  %v479_v20 = vpop.xlane.xlu0 %478  ;;  %v3950_v42 = vld [vmem:[#allocation23_spill] sm:$0xff]  ;;  %v3951_v11 = vld [vmem:[#allocation25_spill] sm:$0xff] }
 0x14b   : > { %686 = vadd.xlane.f32.xlu1 %v685_v38  ;;  %v689_v35 = vadd.f32 %v688_v59, %v612_v21  ;;  %v615_v53 = vmul.f32 %v2947_v19, %v2947_v19  ;;  %v616_v3 = vmul.f32 %v3041_v7, %v3041_v7  ;;  %v3071_v4 = vmul.f32 0.001953125, %v479_v20  ;;  %v3952_v39 = vld [vmem:[#allocation33_spill] sm:$0xff]  ;;  %v3953_v7 = vld [vmem:[#allocation35_spill] sm:$0xff] }
 0x14c   : > { %3949 = vst [vmem:[#allocation28_spill] sm:$0xff] %v3061_v1  ;;  %v617_v22 = vmul.f32 %v3061_v1, %v3061_v1  ;;  %v3076_v62 = vsub.f32 %v3950_v42, %v504_v43  ;;  %v3079_v38 = vsub.f32 %v3951_v11, %v504_v43  ;;  %v3083_v59 = vsub.f32 %v2789_v14, %v3065_v9  ;;  %v3954_v42 = vld [vmem:[#allocation36_spill] sm:$0xff] }
 0x14d   : > { %v690_v21 = vadd.f32 %v689_v35, %v613_v52  ;;  %v3087_v19 = vsub.f32 %v3952_v39, %v3065_v9  ;;  %v693_v20 = vadd.f32 %v615_v53, %v614_v34  ;;  %v3091_v16 = vsub.f32 %v3953_v7, %v3071_v4  ;;  %v494_v43 = vpop.xlane.xlu1 %493 }
 0x14e   : > { %v3095_v1 = vsub.f32 %v3954_v42, %v3071_v4  ;;  %v618_v11 = vmul.f32 %v2985_v23, %v2985_v23  ;;  %v619_v14 = vmul.f32 %v2988_v32, %v2988_v32  ;;  %v620_v34 = vmul.f32 %v3076_v62, %v3076_v62  ;;  %v489_v53 = vpop.xlane.xlu0 %488  ;;  %v3955_v23 = vld [vmem:[#allocation22_spill] sm:$0xff]  ;;  %v3957_v32 = vld [vmem:[#allocation24_spill] sm:$0xff] }
 0x14f   : > { %691 = vadd.xlane.f32.xlu0 %v690_v21  ;;  %v694_v52 = vadd.f32 %v693_v20, %v616_v3  ;;  %v621_v7 = vmul.f32 %v3079_v38, %v3079_v38  ;;  %v3105_v35 = vmul.f32 0.001953125, %v494_v43  ;;  %v3107_v42 = vmul.f32 0.001953125, %v489_v53 }
 0x150   : > { %v698_v39 = vadd.f32 %v619_v14, %v618_v11  ;;  %v3111_v25 = vsub.f32 %v3955_v23, %v2960_v37  ;;  %v3115_v21 = vsub.f32 %v3957_v32, %v2960_v37  ;;  %v622_v11 = vmul.f32 %v2973_v29, %v2973_v29 }
 0x151   : > { %v695_v3 = vadd.f32 %v694_v52, %v617_v22  ;;  %v3119_v20 = vsub.f32 %v2813_v49, %v3105_v35  ;;  %v3123_v43 = vsub.f32 %v2815_v47, %v3105_v35  ;;  %v3129_v23 = vsub.f32 %v2819_v61, %v3107_v42  ;;  %v3963_v22 = vld [vmem:[#allocation27_spill] sm:$0xff] }
 0x152   : > { %3956 = vst [vmem:[#allocation29_spill] sm:$0xff] %v3111_v25  ;;  %3958 = vst [vmem:[#allocation21_spill] sm:$0xff] %v3115_v21  ;;  %v699_v14 = vadd.f32 %v698_v39, %v620_v34  ;;  %v3133_v37 = vsub.f32 %v2821_v40, %v3107_v42  ;;  %v623_v49 = vmul.f32 %v2977_v41, %v2977_v41  ;;  %v3965_v61 = vld [vmem:[#allocation31_spill] sm:$0xff] }
 0x153   : > { %3959 = vst [vmem:[#allocation23_spill] sm:$0xff] %v3119_v20  ;;  %3960 = vst [vmem:[#allocation25_spill] sm:$0xff] %v3123_v43  ;;  %696 = vadd.xlane.f32.xlu1 %v695_v3  ;;  %v624_v47 = vmul.f32 %v3111_v25, %v3111_v25  ;;  %v625_v32 = vmul.f32 %v3115_v21, %v3115_v21  ;;  %v3143_v52 = vsub.f32 %v3963_v22, %v2999_v58  ;;  %v3967_v22 = vld [vmem:[#allocation26_spill] sm:$0xff] }
 0x154   : > { %3961 = vst [vmem:[#allocation33_spill] sm:$0xff] %v3129_v23  ;;  %3962 = vst [vmem:[#allocation35_spill] sm:$0xff] %v3133_v37  ;;  %v3147_v34 = vsub.f32 %v3965_v61, %v2999_v58  ;;  %v700_v40 = vadd.f32 %v699_v14, %v621_v7  ;;  %v703_v53 = vadd.f32 %v623_v49, %v622_v11  ;;  %v3969_v58 = vld [vmem:[#allocation30_spill] sm:$0xff] }
 0x155   : > { %3964 = vst [vmem:[#allocation36_spill] sm:$0xff] %v3143_v52  ;;  %v626_v39 = vmul.f32 %v3018_v44, %v3018_v44  ;;  %v627_v3 = vmul.f32 %v3022_v46, %v3022_v46  ;;  %v628_v25 = vmul.f32 %v3143_v52, %v3143_v52  ;;  %v3159_v41 = vsub.f32 %v3967_v22, %v2990_v17  ;;  %v3971_v52 = vld [vmem:[#allocation34_spill] sm:$0xff] }
 0x156   : > { %3966 = vst [vmem:[#allocation22_spill] sm:$0xff] %v3147_v34  ;;  %v629_v21 = vmul.f32 %v3147_v34, %v3147_v34  ;;  %v3163_v7 = vsub.f32 %v3969_v58, %v2990_v17  ;;  %701 = vadd.xlane.f32.xlu0 %v700_v40  ;;  %v704_v11 = vadd.f32 %v703_v53, %v624_v47  ;;  %v3972_v17 = vld [vmem:[#allocation38_spill] sm:$0xff] }
 0x157   : > { %3968 = vst [vmem:[#allocation24_spill] sm:$0xff] %v3159_v41  ;;  %v708_v14 = vadd.f32 %v627_v3, %v626_v39  ;;  %v630_v49 = vmul.f32 %v3008_v6, %v3008_v6  ;;  %v631_v61 = vmul.f32 %v3012_v31, %v3012_v31  ;;  %v632_v34 = vmul.f32 %v3159_v41, %v3159_v41  ;;  %v3974_v41 = vld [vmem:[#allocation32_spill] sm:$0xff] }
 0x158   : > { %3970 = vst [vmem:[#allocation27_spill] sm:$0xff] %v3163_v7  ;;  %v633_v22 = vmul.f32 %v3163_v7, %v3163_v7  ;;  %v3175_v46 = vsub.f32 %v3971_v52, %v3033_v50  ;;  %v3179_v47 = vsub.f32 %v3972_v17, %v3033_v50  ;;  %v705_v40 = vadd.f32 %v704_v11, %v625_v32  ;;  %v3975_v32 = vld [vmem:[#allocation37_spill] sm:$0xff] }
 0x159   : > { %v709_v53 = vadd.f32 %v708_v14, %v628_v25  ;;  %v713_v39 = vadd.f32 %v631_v61, %v630_v49  ;;  %v634_v3 = vmul.f32 %v3053_v33, %v3053_v33  ;;  %v635_v58 = vmul.f32 %v3057_v48, %v3057_v48 }
 0x15a   : > { %3973 = vst [vmem:[#allocation31_spill] sm:$0xff] %v3179_v47  ;;  %v636_v7 = vmul.f32 %v3175_v46, %v3175_v46  ;;  %v637_v52 = vmul.f32 %v3179_v47, %v3179_v47  ;;  %v3191_v31 = vsub.f32 %v3974_v41, %v3027_v63  ;;  %706 = vadd.xlane.f32.xlu1 %v705_v40  ;;  %v3976_v41 = vld [vmem:[#allocation40_spill] sm:$0xff] }
 0x15b   : > { %v710_v50 = vadd.f32 %v709_v53, %v629_v21  ;;  %v714_v25 = vadd.f32 %v713_v39, %v632_v34  ;;  %v3195_v11 = vsub.f32 %v3975_v32, %v3027_v63  ;;  %v638_v14 = vmul.f32 %v3045_v15, %v3045_v15 }
 0x15c   : > { %v718_v49 = vadd.f32 %v635_v58, %v634_v3  ;;  %v639_v61 = vmul.f32 %v3049_v27, %v3049_v27  ;;  %v640_v17 = vmul.f32 %v3191_v31, %v3191_v31  ;;  %v3205_v47 = vsub.f32 %v3976_v41, %v3071_v4 }
 0x15d   : > { %711 = vadd.xlane.f32.xlu0 %v710_v50  ;;  %v715_v21 = vadd.f32 %v714_v25, %v633_v22  ;;  %v641_v63 = vmul.f32 %v3195_v11, %v3195_v11  ;;  %v3211_v34 = vsub.f32 %v2835_v24, %v3071_v4  ;;  %v642_v40 = vmul.f32 %v3091_v16, %v3091_v16  ;;  %v3977_v50 = vld [vmem:[#allocation39_spill] sm:$0xff] }
 0x15e   : > { %v719_v53 = vadd.f32 %v718_v49, %v636_v7  ;;  %v723_v39 = vadd.f32 %v639_v61, %v638_v14  ;;  %v643_v3 = vmul.f32 %v3095_v1, %v3095_v1  ;;  %v644_v58 = vmul.f32 %v3205_v47, %v3205_v47 }
 0x15f   : > { %716 = vadd.xlane.f32.xlu1 %v715_v21  ;;  %v645_v22 = vmul.f32 %v3211_v34, %v3211_v34  ;;  %v3223_v25 = vsub.f32 %v3977_v50, %v3065_v9  ;;  %v3227_v24 = vsub.f32 %v2828_v51, %v3065_v9  ;;  %v646_v4 = vmul.f32 %v3083_v59, %v3083_v59 }
 0x160   : > { %v720_v7 = vadd.f32 %v719_v53, %v637_v52  ;;  %v724_v32 = vadd.f32 %v723_v39, %v640_v17  ;;  %v728_v14 = vadd.f32 %v643_v3, %v642_v40  ;;  %v647_v49 = vmul.f32 %v3087_v19, %v3087_v19 }
 0x161   : > { %v648_v61 = vmul.f32 %v3223_v25, %v3223_v25  ;;  %v649_v41 = vmul.f32 %v3227_v24, %v3227_v24  ;;  %v3239_v21 = vsub.f32 %v2837_v30, %v3107_v42  ;;  %v3243_v51 = vsub.f32 %v2845_v54, %v3107_v42  ;;  %v3980_v30 = vld [vmem:[#allocation41_spill] sm:$0xff] }
 0x162   : > { %721 = vadd.xlane.f32.xlu0 %v720_v7  ;;  %v725_v9 = vadd.f32 %v724_v32, %v641_v63  ;;  %v729_v52 = vadd.f32 %v728_v14, %v644_v58  ;;  %v733_v17 = vadd.f32 %v647_v49, %v646_v4  ;;  %v650_v40 = vmul.f32 %v3129_v23, %v3129_v23  ;;  %v3982_v63 = vld [vmem:[#allocation42_spill] sm:$0xff] }
 0x163   : > { %3978 = vst [vmem:[#allocation26_spill] sm:$0xff] %v3239_v21  ;;  %3979 = vst [vmem:[#allocation30_spill] sm:$0xff] %v3243_v51  ;;  %v651_v53 = vmul.f32 %v3133_v37, %v3133_v37  ;;  %v652_v39 = vmul.f32 %v3239_v21, %v3239_v21  ;;  %v3253_v3 = vsub.f32 %v3980_v30, %v3105_v35  ;;  %v3992_v37 = vld [vmem:[#allocation46_spill] sm:$0xff] }
 0x164   : > { %726 = vadd.xlane.f32.xlu1 %v725_v9  ;;  %v730_v54 = vadd.f32 %v729_v52, %v645_v22  ;;  %v734_v42 = vadd.f32 %v733_v17, %v648_v61  ;;  %v3257_v58 = vsub.f32 %v3982_v63, %v3105_v35  ;;  %v654_v50 = vmul.f32 %v3119_v20, %v3119_v20 }
 0x165   : > { %3981 = vst [vmem:[#allocation34_spill] sm:$0xff] %v3253_v3  ;;  %v653_v4 = vmul.f32 %v3243_v51, %v3243_v51  ;;  %v738_v7 = vadd.f32 %v651_v53, %v650_v40  ;;  %v655_v32 = vmul.f32 %v3123_v43, %v3123_v43  ;;  %v656_v14 = vmul.f32 %v3253_v3, %v3253_v3  ;;  %v3987_v3 = vld [vmem:[#allocation49_spill] sm:$0xff] }
 0x166   : > { %3983 = vst [vmem:[#allocation38_spill] sm:$0xff] %v3257_v58  ;;  %731 = vadd.xlane.f32.xlu0 %v730_v54  ;;  %v735_v22 = vadd.f32 %v734_v42, %v649_v41  ;;  %v657_v35 = vmul.f32 %v3257_v58, %v3257_v58  ;;  %v876_v53 = vlaneseq }
 0x167   : > { %v739_v49 = vadd.f32 %v738_v7, %v652_v39  ;;  %v743_v61 = vadd.f32 %v655_v32, %v654_v50  ;;  %v874_v32 = vld [vmem:[#allocation7] sm:$0xf] }
 0x168   : > { %736 = vadd.xlane.f32.xlu1 %v735_v22  ;;  %v877_v20 = vshrl.u32 %v876_v53, 7 }
 0x169   : > { %v740_v9 = vadd.f32 %v739_v49, %v653_v4  ;;  %v744_v52 = vadd.f32 %v743_v61, %v656_v14 }
 0x16a   : > { %v878_v58 = vsub.s32 0, %v877_v20  ;;  %v882_v50 = vsub.s32 1, %v877_v20  ;;  %v886_v14 = vsub.s32 2, %v877_v20  ;;  %v890_v22 = vsub.s32 3, %v877_v20 }
 0x16b   : > { %741 = vadd.xlane.f32.xlu0 %v740_v9  ;;  %v745_v17 = vadd.f32 %v744_v52, %v657_v35  ;;  %v968_v35 = vld [vmem:[%s3984_s21] sm:$0xf] }
 0x16c   : > { %v3272_v52 = vrot.slane %v874_v32, %v878_v58  ;;  %v3278_v53 = vrot.slane %v874_v32, %v890_v22 }
 0x16d   : > { %746 = vadd.xlane.f32.xlu1 %v745_v17 }
 0x1c9   : > { %v662_v40 = vpop.xlane.xlu0 %661 }
 0x1ca   : > { %v748_v30 = vmul.f32 0.001953125, %v662_v40  ;;  %v3276_v40 = vrot.slane %v874_v32, %v886_v14 }
 0x1cc   : > { %v766_v63 = vadd.f32 1e-05, %v748_v30  ;;  %v3280_v30 = vrot.slane %v968_v35, %v878_v58 }
 0x1cd   : > { %v672_v43 = vpop.xlane.xlu0 %671 }
 0x1ce   : > { %2078 = vrsqrt.f32 %v766_v63  ;;  %v667_v54 = vpop.xlane.xlu1 %666  ;;  %v750_v41 = vmul.f32 0.001953125, %v672_v43  ;;  %v3274_v43 = vrot.slane %v874_v32, %v882_v50  ;;  %v3282_v63 = vrot.slane %v968_v35, %v882_v50  ;;  %v3988_v32 = vld [vmem:[#allocation50_spill] sm:$0xff] }
 0x1cf   : > { %v749_v39 = vmul.f32 0.001953125, %v667_v54  ;;  %v3284_v54 = vrot.slane %v968_v35, %v886_v14 }
 0x1d0   : > { %v768_v42 = vadd.f32 1e-05, %v750_v41  ;;  %v3286_v41 = vrot.slane %v968_v35, %v890_v22 }
 0x1d1   : > { %v767_v7 = vadd.f32 1e-05, %v749_v39 }
 0x1d2   : > { %2080 = vrsqrt.f32 %v768_v42  ;;  %v677_v4 = vpop.xlane.xlu1 %676 }
 0x1d3   : > { %2082 = vrsqrt.f32 %v767_v7  ;;  %v751_v49 = vmul.f32 0.001953125, %v677_v4  ;;  %v3985_v7 = vld [vmem:[#allocation47_spill] sm:$0xff] }
 0x1d5   : > { %v769_v61 = vadd.f32 1e-05, %v751_v49  ;;  %v682_v9 = vpop.xlane.xlu0 %681  ;;  %v3986_v49 = vld [vmem:[#allocation48_spill] sm:$0xff] }
 0x1d6   : > { %v752_v17 = vmul.f32 0.001953125, %v682_v9 }
 0x1d7   : > { %2084 = vrsqrt.f32 %v769_v61 }
 0x1d8   : > { %v2079_v20 = vpop.eup %2078  ;;  %v770_v39 = vadd.f32 1e-05, %v752_v17  ;;  %v687_v42 = vpop.xlane.xlu1 %686 }
 0x1d9   : > { %v802_v4 = vmul.f32 %v2079_v20, %v3985_v7  ;;  %v803_v9 = vmul.f32 %v2079_v20, %v3986_v49  ;;  %v804_v51 = vmul.f32 %v2079_v20, %v3987_v3  ;;  %v805_v21 = vmul.f32 %v2079_v20, %v3988_v32  ;;  %v3989_v32 = vld [vmem:[#allocation43_spill] sm:$0xff] }
 0x1da   : > { %2086 = vrsqrt.f32 %v770_v39  ;;  %v753_v58 = vmul.f32 0.001953125, %v687_v42 }
 0x1db   : > { %v896_v61 = vmul.f32 %v3272_v52, %v802_v4  ;;  %v897_v50 = vmul.f32 %v3274_v43, %v803_v9  ;;  %v898_v14 = vmul.f32 %v3276_v40, %v804_v51  ;;  %v899_v22 = vmul.f32 %v3278_v53, %v805_v21 }
 0x1dc   : > { %v2081_v35 = vpop.eup %2080  ;;  %v3296_v17 = vadd.f32 1e-05, %v753_v58  ;;  %v3302_v42 = vpop.xlane.xlu0 %691 }
 0x1dd   : > { %v2083_v7 = vpop.eup %2082  ;;  %v990_v49 = vadd.f32 %v3280_v30, %v896_v61  ;;  %v991_v3 = vadd.f32 %v3282_v63, %v897_v50  ;;  %v992_v20 = vadd.f32 %v3284_v54, %v898_v14  ;;  %v993_v39 = vadd.f32 %v3286_v41, %v899_v22  ;;  %v3990_v61 = vld [vmem:[#allocation44_spill] sm:$0xff]  ;;  %v3991_v14 = vld [vmem:[#allocation45_spill] sm:$0xff] }
 0x1de   : > { %v806_v4 = vmul.f32 %v2083_v7, %v2896_v45  ;;  %v807_v51 = vmul.f32 %v2083_v7, %v2899_v10  ;;  %v808_v21 = vmul.f32 %v2083_v7, %v2902_v12  ;;  %v809_v9 = vmul.f32 %v2083_v7, %v2905_v60 }
 0x1df   : > { %1062 = vst [vmem:[#allocation3] sm:$0xff] %v990_v49  ;;  %1063 = vst [vmem:[#allocation3 + $0x8] sm:$0xff] %v991_v3  ;;  %v810_v58 = vmul.f32 %v2081_v35, %v3989_v32  ;;  %v811_v50 = vmul.f32 %v2081_v35, %v3990_v61  ;;  %v812_v22 = vmul.f32 %v2081_v35, %v3991_v14  ;;  %2088 = vrsqrt.f32 %v3296_v17 }
 0x1e0   : > { %1099 = vst [vmem:[#allocation3 + $0x120] sm:$0xff] %v992_v20  ;;  %1100 = vst [vmem:[#allocation3 + $0x128] sm:$0xff] %v993_v39  ;;  %v813_v23 = vmul.f32 %v2081_v35, %v3992_v37  ;;  %v900_v45 = vmul.f32 %v3272_v52, %v806_v4  ;;  %v901_v10 = vmul.f32 %v3274_v43, %v807_v51  ;;  %v697_v32 = vpop.xlane.xlu1 %696 }
 0x1e1   : > { %v902_v12 = vmul.f32 %v3276_v40, %v808_v21  ;;  %v903_v60 = vmul.f32 %v3278_v53, %v809_v9  ;;  %v2085_v7 = vpop.eup %2084  ;;  %v904_v49 = vmul.f32 %v3272_v52, %v810_v58  ;;  %v905_v3 = vmul.f32 %v3274_v43, %v811_v50 }
 0x1e2   : > { %v906_v20 = vmul.f32 %v3276_v40, %v812_v22  ;;  %v907_v39 = vmul.f32 %v3278_v53, %v813_v23  ;;  %v994_v37 = vadd.f32 %v3280_v30, %v900_v45  ;;  %v995_v35 = vadd.f32 %v3282_v63, %v901_v10 }
 0x1e3   : > { %v996_v4 = vadd.f32 %v3284_v54, %v902_v12  ;;  %v997_v51 = vadd.f32 %v3286_v41, %v903_v60  ;;  %v998_v21 = vadd.f32 %v3280_v30, %v904_v49  ;;  %v999_v9 = vadd.f32 %v3282_v63, %v905_v3  ;;  %v702_v50 = vpop.xlane.xlu0 %701 }
 0x1e4   : > { %v1000_v58 = vadd.f32 %v3284_v54, %v906_v20  ;;  %v1001_v61 = vadd.f32 %v3286_v41, %v907_v39  ;;  %v2087_v14 = vpop.eup %2086  ;;  %1064 = vst [vmem:[#allocation3 + $0x10] sm:$0xff] %v994_v37  ;;  %1065 = vst [vmem:[#allocation3 + $0x18] sm:$0xff] %v995_v35  ;;  %v814_v23 = vmul.f32 %v2085_v7, %v2886_v57 }
 0x1e5   : > { %1101 = vst [vmem:[#allocation3 + $0x130] sm:$0xff] %v996_v4  ;;  %1102 = vst [vmem:[#allocation3 + $0x138] sm:$0xff] %v997_v51  ;;  %v815_v22 = vmul.f32 %v2085_v7, %v2889_v8  ;;  %v816_v45 = vmul.f32 %v2085_v7, %v2908_v0  ;;  %v817_v10 = vmul.f32 %v2085_v7, %v2933_v5 }
 0x1e6   : > { %1066 = vst [vmem:[#allocation3 + $0x20] sm:$0xff] %v998_v21  ;;  %1067 = vst [vmem:[#allocation3 + $0x28] sm:$0xff] %v999_v9  ;;  %v818_v12 = vmul.f32 %v2087_v14, %v2923_v13  ;;  %v819_v60 = vmul.f32 %v2087_v14, %v2926_v56  ;;  %v820_v49 = vmul.f32 %v2087_v14, %v2958_v36 }
 0x1e7   : > { %1103 = vst [vmem:[#allocation3 + $0x140] sm:$0xff] %v1000_v58  ;;  %1104 = vst [vmem:[#allocation3 + $0x148] sm:$0xff] %v1001_v61  ;;  %v821_v3 = vmul.f32 %v2087_v14, %v2963_v26  ;;  %v908_v57 = vmul.f32 %v3272_v52, %v814_v23  ;;  %v909_v8 = vmul.f32 %v3274_v43, %v815_v22  ;;  %v707_v39 = vpop.xlane.xlu1 %706  ;;  %v754_v61 = vmul.f32 0.001953125, %v3302_v42 }
 0x1e8   : > { %v910_v0 = vmul.f32 %v3276_v40, %v816_v45  ;;  %v911_v5 = vmul.f32 %v3278_v53, %v817_v10  ;;  %v912_v7 = vmul.f32 %v3272_v52, %v818_v12  ;;  %v913_v20 = vmul.f32 %v3274_v43, %v819_v60 }
 0x1e9   : > { %v914_v13 = vmul.f32 %v3276_v40, %v820_v49  ;;  %v915_v56 = vmul.f32 %v3278_v53, %v821_v3  ;;  %v1002_v36 = vadd.f32 %v3280_v30, %v908_v57  ;;  %v1003_v26 = vadd.f32 %v3282_v63, %v909_v8 }
 0x1ea   : > { %v1004_v37 = vadd.f32 %v3284_v54, %v910_v0  ;;  %v1005_v35 = vadd.f32 %v3286_v41, %v911_v5  ;;  %v1006_v4 = vadd.f32 %v3280_v30, %v912_v7  ;;  %v1007_v51 = vadd.f32 %v3282_v63, %v913_v20  ;;  %v712_v58 = vpop.xlane.xlu0 %711 }
 0x1eb   : > { %v1008_v21 = vadd.f32 %v3284_v54, %v914_v13  ;;  %v1009_v9 = vadd.f32 %v3286_v41, %v915_v56  ;;  %1068 = vst [vmem:[#allocation3 + $0x30] sm:$0xff] %v1002_v36  ;;  %1069 = vst [vmem:[#allocation3 + $0x38] sm:$0xff] %v1003_v26  ;;  %v755_v14 = vmul.f32 0.001953125, %v697_v32  ;;  %v756_v23 = vmul.f32 0.001953125, %v702_v50  ;;  %v2089_v56 = vpop.eup %2088 }
 0x1ec   : > { %1105 = vst [vmem:[#allocation3 + $0x150] sm:$0xff] %v1004_v37  ;;  %1106 = vst [vmem:[#allocation3 + $0x158] sm:$0xff] %v1005_v35  ;;  %v757_v22 = vmul.f32 0.001953125, %v707_v39  ;;  %v758_v45 = vmul.f32 0.001953125, %v712_v58  ;;  %v717_v10 = vpop.xlane.xlu1 %716  ;;  %v772_v12 = vadd.f32 1e-05, %v754_v61  ;;  %v822_v36 = vmul.f32 %v2089_v56, %v2913_v55 }
 0x1ed   : > { %1070 = vst [vmem:[#allocation3 + $0x40] sm:$0xff] %v1006_v4  ;;  %1071 = vst [vmem:[#allocation3 + $0x48] sm:$0xff] %v1007_v51  ;;  %v773_v60 = vadd.f32 1e-05, %v755_v14  ;;  %v774_v49 = vadd.f32 1e-05, %v756_v23  ;;  %v823_v26 = vmul.f32 %v2089_v56, %v2916_v28  ;;  %v824_v37 = vmul.f32 %v2089_v56, %v2982_v2 }
 0x1ee   : > { %1107 = vst [vmem:[#allocation3 + $0x160] sm:$0xff] %v1008_v21  ;;  %1108 = vst [vmem:[#allocation3 + $0x168] sm:$0xff] %v1009_v9  ;;  %v775_v3 = vadd.f32 1e-05, %v757_v22  ;;  %v759_v57 = vmul.f32 0.001953125, %v717_v10  ;;  %2090 = vrsqrt.f32 %v772_v12  ;;  %v825_v35 = vmul.f32 %v2089_v56, %v2993_v18 }
 0x1ef   : > { %v776_v8 = vadd.f32 1e-05, %v758_v45  ;;  %v722_v0 = vpop.xlane.xlu0 %721  ;;  %2092 = vrsqrt.f32 %v773_v60  ;;  %v916_v21 = vmul.f32 %v3272_v52, %v822_v36  ;;  %v917_v9 = vmul.f32 %v3274_v43, %v823_v26  ;;  %v3993_v60 = vld [vmem:[#allocation53_spill] sm:$0xff] }
 0x1f0   : > { %v777_v17 = vadd.f32 1e-05, %v759_v57  ;;  %v760_v42 = vmul.f32 0.001953125, %v722_v0  ;;  %2094 = vrsqrt.f32 %v774_v49  ;;  %v918_v58 = vmul.f32 %v3276_v40, %v824_v37 }
 0x1f1   : > { %v727_v32 = vpop.xlane.xlu1 %726  ;;  %2096 = vrsqrt.f32 %v775_v3  ;;  %v919_v61 = vmul.f32 %v3278_v53, %v825_v35  ;;  %v1010_v18 = vadd.f32 %v3280_v30, %v916_v21  ;;  %v1011_v22 = vadd.f32 %v3282_v63, %v917_v9  ;;  %v3994_v3 = vld [vmem:[#allocation54_spill] sm:$0xff] }
 0x1f2   : > { %v778_v50 = vadd.f32 1e-05, %v760_v42  ;;  %v761_v5 = vmul.f32 0.001953125, %v727_v32  ;;  %2098 = vrsqrt.f32 %v776_v8  ;;  %v1012_v45 = vadd.f32 %v3284_v54, %v918_v58  ;;  %v3995_v8 = vld [vmem:[#allocation58_spill] sm:$0xff] }
 0x1f3   : > { %v732_v7 = vpop.xlane.xlu0 %731  ;;  %2100 = vrsqrt.f32 %v777_v17  ;;  %v1013_v10 = vadd.f32 %v3286_v41, %v919_v61  ;;  %v3996_v17 = vld [vmem:[#allocation61_spill] sm:$0xff]  ;;  %1072 = vst [vmem:[#allocation3 + $0x50] sm:$0xff] %v1010_v18  ;;  %1073 = vst [vmem:[#allocation3 + $0x58] sm:$0xff] %v1011_v22 }
 0x1f4   : > { %v779_v20 = vadd.f32 1e-05, %v761_v5  ;;  %v762_v13 = vmul.f32 0.001953125, %v732_v7  ;;  %2102 = vrsqrt.f32 %v778_v50  ;;  %1109 = vst [vmem:[#allocation3 + $0x170] sm:$0xff] %v1012_v45  ;;  %v3997_v50 = vld [vmem:[#allocation51_spill] sm:$0xff]  ;;  %v3998_v7 = vld [vmem:[#allocation52_spill] sm:$0xff] }
 0x1f5   : > { %v737_v39 = vpop.xlane.xlu1 %736  ;;  %1110 = vst [vmem:[#allocation3 + $0x178] sm:$0xff] %v1013_v10 }
 0x1f6   : > { %2104 = vrsqrt.f32 %v779_v20  ;;  %v780_v4 = vadd.f32 1e-05, %v762_v13  ;;  %v763_v51 = vmul.f32 0.001953125, %v737_v39  ;;  %v3999_v13 = vld [vmem:[#allocation62_spill] sm:$0xff]  ;;  %v4000_v39 = vld [vmem:[#allocation28_spill] sm:$0xff] }
 0x1f8   : > { %v742_v14 = vpop.xlane.xlu0 %741  ;;  %v2091_v23 = vpop.eup %2090  ;;  %2106 = vrsqrt.f32 %v780_v4  ;;  %v3362_v55 = vadd.f32 1e-05, %v763_v51 }
 0x1f9   : > { %v3364_v28 = vmul.f32 0.001953125, %v742_v14  ;;  %v2093_v2 = vpop.eup %2092  ;;  %v826_v49 = vmul.f32 %v2091_v23, %v3993_v60  ;;  %v827_v57 = vmul.f32 %v2091_v23, %v3994_v3  ;;  %v828_v0 = vmul.f32 %v2091_v23, %v3995_v8  ;;  %v4001_v8 = vld [vmem:[#allocation56_spill] sm:$0xff] }
 0x1fa   : > { %v2095_v12 = vpop.eup %2094  ;;  %v829_v42 = vmul.f32 %v2091_v23, %v3996_v17  ;;  %v830_v5 = vmul.f32 %v2093_v2, %v3997_v50  ;;  %v831_v20 = vmul.f32 %v2093_v2, %v3998_v7  ;;  %v832_v56 = vmul.f32 %v2093_v2, %v3999_v13  ;;  %v4002_v17 = vld [vmem:[#allocation57_spill] sm:$0xff] }
 0x1fb   : > { %v2097_v32 = vpop.eup %2096  ;;  %v833_v36 = vmul.f32 %v2093_v2, %v4000_v39  ;;  %v920_v37 = vmul.f32 %v3272_v52, %v826_v49  ;;  %v921_v35 = vmul.f32 %v3274_v43, %v827_v57  ;;  %v922_v4 = vmul.f32 %v3276_v40, %v828_v0 }
 0x1fc   : > { %v2099_v26 = vpop.eup %2098  ;;  %v923_v51 = vmul.f32 %v3278_v53, %v829_v42  ;;  %v924_v9 = vmul.f32 %v3272_v52, %v830_v5  ;;  %v925_v58 = vmul.f32 %v3274_v43, %v831_v20  ;;  %v926_v61 = vmul.f32 %v3276_v40, %v832_v56  ;;  %v4003_v20 = vld [vmem:[#allocation55_spill] sm:$0xff]  ;;  %v4004_v56 = vld [vmem:[#allocation29_spill] sm:$0xff] }
 0x1fd   : > { %v3382_v21 = vpop.eup %2100  ;;  %v927_v14 = vmul.f32 %v3278_v53, %v833_v36  ;;  %v1014_v2 = vadd.f32 %v3280_v30, %v920_v37  ;;  %v1015_v18 = vadd.f32 %v3282_v63, %v921_v35  ;;  %v1016_v22 = vadd.f32 %v3284_v54, %v922_v4  ;;  %v4005_v36 = vld [vmem:[#allocation21_spill] sm:$0xff] }
 0x1fe   : > { %v3388_v23 = vpop.eup %2102  ;;  %v1017_v45 = vadd.f32 %v3286_v41, %v923_v51  ;;  %v1018_v10 = vadd.f32 %v3280_v30, %v924_v9  ;;  %v1019_v60 = vadd.f32 %v3282_v63, %v925_v58  ;;  %v1020_v49 = vadd.f32 %v3284_v54, %v926_v61 }
 0x1ff   : > { %v1021_v3 = vadd.f32 %v3286_v41, %v927_v14  ;;  %1074 = vst [vmem:[#allocation3 + $0x60] sm:$0xff] %v1014_v2  ;;  %1075 = vst [vmem:[#allocation3 + $0x68] sm:$0xff] %v1015_v18  ;;  %v834_v0 = vmul.f32 %v2095_v12, %v4001_v8  ;;  %v835_v42 = vmul.f32 %v2095_v12, %v4002_v17  ;;  %v4007_v8 = vld [vmem:[#allocation36_spill] sm:$0xff]  ;;  %v4008_v17 = vld [vmem:[#allocation22_spill] sm:$0xff]  ;;  %2108 = vrsqrt.f32 %v3362_v55 }
 0x200   : > { %v3398_v57 = vpop.eup %2104  ;;  %1111 = vst [vmem:[#allocation3 + $0x180] sm:$0xff] %v1016_v22  ;;  %1112 = vst [vmem:[#allocation3 + $0x188] sm:$0xff] %v1017_v45  ;;  %v836_v50 = vmul.f32 %v2095_v12, %v3076_v62  ;;  %v837_v5 = vmul.f32 %v2095_v12, %v3079_v38  ;;  %v838_v7 = vmul.f32 %v2097_v32, %v2973_v29 }
 0x201   : > { %1076 = vst [vmem:[#allocation3 + $0x70] sm:$0xff] %v1018_v10  ;;  %1077 = vst [vmem:[#allocation3 + $0x78] sm:$0xff] %v1019_v60  ;;  %v839_v13 = vmul.f32 %v2097_v32, %v4003_v20  ;;  %v840_v39 = vmul.f32 %v2097_v32, %v4004_v56  ;;  %v841_v37 = vmul.f32 %v2097_v32, %v4005_v36  ;;  %v4010_v20 = vld [vmem:[#allocation24_spill] sm:$0xff] }
 0x202   : > { %1113 = vst [vmem:[#allocation3 + $0x190] sm:$0xff] %v1020_v49  ;;  %1114 = vst [vmem:[#allocation3 + $0x198] sm:$0xff] %v1021_v3  ;;  %v3408_v35 = vpop.eup %2106  ;;  %v928_v4 = vmul.f32 %v3272_v52, %v834_v0  ;;  %v929_v62 = vmul.f32 %v3274_v43, %v835_v42  ;;  %v930_v38 = vmul.f32 %v3276_v40, %v836_v50  ;;  %v4006_v49 = vld [vmem:[#allocation60_spill] sm:$0xff] }
 0x203   : > { %v931_v12 = vmul.f32 %v3278_v53, %v837_v5  ;;  %v932_v51 = vmul.f32 %v3272_v52, %v838_v7  ;;  %v933_v29 = vmul.f32 %v3274_v43, %v839_v13  ;;  %v934_v9 = vmul.f32 %v3276_v40, %v840_v39  ;;  %v4009_v5 = vld [vmem:[#allocation59_spill] sm:$0xff] }
 0x204   : > { %v935_v58 = vmul.f32 %v3278_v53, %v841_v37  ;;  %v1022_v32 = vadd.f32 %v3280_v30, %v928_v4  ;;  %v1023_v61 = vadd.f32 %v3282_v63, %v929_v62  ;;  %v1024_v14 = vadd.f32 %v3284_v54, %v930_v38 }
 0x205   : > { %v1025_v2 = vadd.f32 %v3286_v41, %v931_v12  ;;  %v1026_v18 = vadd.f32 %v3280_v30, %v932_v51  ;;  %v1027_v22 = vadd.f32 %v3282_v63, %v933_v29  ;;  %v1028_v45 = vadd.f32 %v3284_v54, %v934_v9 }
 0x206   : > { %v1029_v10 = vadd.f32 %v3286_v41, %v935_v58  ;;  %1078 = vst [vmem:[#allocation3 + $0x80] sm:$0xff] %v1022_v32  ;;  %1079 = vst [vmem:[#allocation3 + $0x88] sm:$0xff] %v1023_v61  ;;  %v842_v60 = vmul.f32 %v2099_v26, %v3018_v44  ;;  %v843_v3 = vmul.f32 %v2099_v26, %v4006_v49  ;;  %v4011_v44 = vld [vmem:[#allocation27_spill] sm:$0xff] }
 0x207   : > { %1115 = vst [vmem:[#allocation3 + $0x1a0] sm:$0xff] %v1024_v14  ;;  %1116 = vst [vmem:[#allocation3 + $0x1a8] sm:$0xff] %v1025_v2  ;;  %v844_v0 = vmul.f32 %v2099_v26, %v4007_v8  ;;  %v845_v42 = vmul.f32 %v2099_v26, %v4008_v17  ;;  %v846_v50 = vmul.f32 %v3382_v21, %v3008_v6 }
 0x208   : > { %1080 = vst [vmem:[#allocation3 + $0x90] sm:$0xff] %v1026_v18  ;;  %1081 = vst [vmem:[#allocation3 + $0x98] sm:$0xff] %v1027_v22  ;;  %v847_v7 = vmul.f32 %v3382_v21, %v4009_v5  ;;  %v848_v13 = vmul.f32 %v3382_v21, %v4010_v20  ;;  %v849_v56 = vmul.f32 %v3382_v21, %v4011_v44  ;;  %v4012_v22 = vld [vmem:[#allocation31_spill] sm:$0xff] }
 0x209   : > { %1117 = vst [vmem:[#allocation3 + $0x1b0] sm:$0xff] %v1028_v45  ;;  %1118 = vst [vmem:[#allocation3 + $0x1b8] sm:$0xff] %v1029_v10  ;;  %v936_v39 = vmul.f32 %v3272_v52, %v842_v60  ;;  %v937_v26 = vmul.f32 %v3274_v43, %v843_v3  ;;  %v938_v36 = vmul.f32 %v3276_v40, %v844_v0 }
 0x20a   : > { %v939_v37 = vmul.f32 %v3278_v53, %v845_v42  ;;  %v940_v4 = vmul.f32 %v3272_v52, %v846_v50  ;;  %v941_v6 = vmul.f32 %v3274_v43, %v847_v7  ;;  %v942_v62 = vmul.f32 %v3276_v40, %v848_v13  ;;  %v747_v42 = vpop.xlane.xlu1 %746 }
 0x20b   : > { %v943_v38 = vmul.f32 %v3278_v53, %v849_v56  ;;  %v1030_v12 = vadd.f32 %v3280_v30, %v936_v39  ;;  %v1031_v21 = vadd.f32 %v3282_v63, %v937_v26  ;;  %v1032_v51 = vadd.f32 %v3284_v54, %v938_v36 }
 0x20c   : > { %v1033_v29 = vadd.f32 %v3286_v41, %v939_v37  ;;  %v1034_v9 = vadd.f32 %v3280_v30, %v940_v4  ;;  %v1035_v58 = vadd.f32 %v3282_v63, %v941_v6  ;;  %v1036_v32 = vadd.f32 %v3284_v54, %v942_v62 }
 0x20d   : > { %v1037_v61 = vadd.f32 %v3286_v41, %v943_v38  ;;  %1082 = vst [vmem:[#allocation3 + $0xa0] sm:$0xff] %v1030_v12  ;;  %1083 = vst [vmem:[#allocation3 + $0xa8] sm:$0xff] %v1031_v21  ;;  %v850_v14 = vmul.f32 %v3388_v23, %v3053_v33  ;;  %v851_v2 = vmul.f32 %v3388_v23, %v3057_v48  ;;  %v782_v26 = vadd.f32 1e-05, %v3364_v28  ;;  %v2109_v28 = vpop.eup %2108 }
 0x20e   : > { %1119 = vst [vmem:[#allocation3 + $0x1c0] sm:$0xff] %v1032_v51  ;;  %1120 = vst [vmem:[#allocation3 + $0x1c8] sm:$0xff] %v1033_v29  ;;  %v852_v18 = vmul.f32 %v3388_v23, %v3175_v46  ;;  %v853_v45 = vmul.f32 %v3388_v23, %v4012_v22  ;;  %v854_v10 = vmul.f32 %v3398_v57, %v3045_v15  ;;  %v765_v36 = vmul.f32 0.001953125, %v747_v42  ;;  %v4015_v22 = vld [vmem:[#allocation26_spill] sm:$0xff] }
 0x20f   : > { %1084 = vst [vmem:[#allocation3 + $0xb0] sm:$0xff] %v1034_v9  ;;  %1085 = vst [vmem:[#allocation3 + $0xb8] sm:$0xff] %v1035_v58  ;;  %v855_v60 = vmul.f32 %v3398_v57, %v3049_v27  ;;  %v856_v33 = vmul.f32 %v3398_v57, %v3191_v31  ;;  %v857_v48 = vmul.f32 %v3398_v57, %v3195_v11  ;;  %2110 = vrsqrt.f32 %v782_v26 }
 0x210   : > { %1121 = vst [vmem:[#allocation3 + $0x1d0] sm:$0xff] %v1036_v32  ;;  %1122 = vst [vmem:[#allocation3 + $0x1d8] sm:$0xff] %v1037_v61  ;;  %v944_v46 = vmul.f32 %v3272_v52, %v850_v14  ;;  %v945_v23 = vmul.f32 %v3274_v43, %v851_v2  ;;  %v946_v49 = vmul.f32 %v3276_v40, %v852_v18  ;;  %v783_v4 = vadd.f32 1e-05, %v765_v36  ;;  %v4013_v14 = vld [vmem:[#allocation33_spill] sm:$0xff]  ;;  %v4014_v18 = vld [vmem:[#allocation35_spill] sm:$0xff] }
 0x211   : > { %v947_v3 = vmul.f32 %v3278_v53, %v853_v45  ;;  %v948_v8 = vmul.f32 %v3272_v52, %v854_v10  ;;  %v949_v15 = vmul.f32 %v3274_v43, %v855_v60  ;;  %v950_v27 = vmul.f32 %v3276_v40, %v856_v33  ;;  %v4016_v45 = vld [vmem:[#allocation30_spill] sm:$0xff] }
 0x212   : > { %v951_v0 = vmul.f32 %v3278_v53, %v857_v48  ;;  %v1038_v31 = vadd.f32 %v3280_v30, %v944_v46  ;;  %v1039_v11 = vadd.f32 %v3282_v63, %v945_v23  ;;  %v1040_v57 = vadd.f32 %v3284_v54, %v946_v49 }
 0x213   : > { %v1041_v17 = vadd.f32 %v3286_v41, %v947_v3  ;;  %v1042_v50 = vadd.f32 %v3280_v30, %v948_v8  ;;  %v1043_v5 = vadd.f32 %v3282_v63, %v949_v15  ;;  %v1044_v7 = vadd.f32 %v3284_v54, %v950_v27  ;;  %v4017_v3 = vld [vmem:[#allocation23_spill] sm:$0xff]  ;;  %v4018_v15 = vld [vmem:[#allocation25_spill] sm:$0xff] }
 0x214   : > { %v1045_v20 = vadd.f32 %v3286_v41, %v951_v0  ;;  %1086 = vst [vmem:[#allocation3 + $0xc0] sm:$0xff] %v1038_v31  ;;  %1087 = vst [vmem:[#allocation3 + $0xc8] sm:$0xff] %v1039_v11  ;;  %v858_v13 = vmul.f32 %v3408_v35, %v3091_v16  ;;  %v859_v44 = vmul.f32 %v3408_v35, %v3095_v1  ;;  %2112 = vrsqrt.f32 %v783_v4  ;;  %v4019_v0 = vld [vmem:[#allocation34_spill] sm:$0xff] }
 0x215   : > { %1123 = vst [vmem:[#allocation3 + $0x1e0] sm:$0xff] %v1040_v57  ;;  %1124 = vst [vmem:[#allocation3 + $0x1e8] sm:$0xff] %v1041_v17  ;;  %v860_v56 = vmul.f32 %v3408_v35, %v3205_v47  ;;  %v861_v39 = vmul.f32 %v3408_v35, %v3211_v34  ;;  %v862_v62 = vmul.f32 %v2109_v28, %v3083_v59  ;;  %v4020_v11 = vld [vmem:[#allocation38_spill] sm:$0xff] }
 0x216   : > { %1088 = vst [vmem:[#allocation3 + $0xd0] sm:$0xff] %v1042_v50  ;;  %1089 = vst [vmem:[#allocation3 + $0xd8] sm:$0xff] %v1043_v5  ;;  %v952_v16 = vmul.f32 %v3272_v52, %v858_v13  ;;  %v953_v37 = vmul.f32 %v3274_v43, %v859_v44  ;;  %v863_v38 = vmul.f32 %v2109_v28, %v3087_v19 }
 0x217   : > { %1125 = vst [vmem:[#allocation3 + $0x1f0] sm:$0xff] %v1044_v7  ;;  %1126 = vst [vmem:[#allocation3 + $0x1f8] sm:$0xff] %v1045_v20  ;;  %v954_v1 = vmul.f32 %v3276_v40, %v860_v56  ;;  %v955_v47 = vmul.f32 %v3278_v53, %v861_v39  ;;  %v864_v12 = vmul.f32 %v2109_v28, %v3223_v25 }
 0x218   : > { %v1046_v34 = vadd.f32 %v3280_v30, %v952_v16  ;;  %v1047_v35 = vadd.f32 %v3282_v63, %v953_v37  ;;  %v865_v21 = vmul.f32 %v2109_v28, %v3227_v24  ;;  %v956_v29 = vmul.f32 %v3272_v52, %v862_v62 }
 0x219   : > { %v1048_v6 = vadd.f32 %v3284_v54, %v954_v1  ;;  %v1049_v55 = vadd.f32 %v3286_v41, %v955_v47  ;;  %v2111_v51 = vpop.eup %2110  ;;  %v957_v9 = vmul.f32 %v3274_v43, %v863_v38  ;;  %v958_v58 = vmul.f32 %v3276_v40, %v864_v12 }
 0x21a   : > { %1090 = vst [vmem:[#allocation3 + $0xe0] sm:$0xff] %v1046_v34  ;;  %1091 = vst [vmem:[#allocation3 + $0xe8] sm:$0xff] %v1047_v35  ;;  %v959_v32 = vmul.f32 %v3278_v53, %v865_v21  ;;  %v866_v2 = vmul.f32 %v2111_v51, %v4013_v14  ;;  %v867_v59 = vmul.f32 %v2111_v51, %v4014_v18 }
 0x21b   : > { %1127 = vst [vmem:[#allocation3 + $0x200] sm:$0xff] %v1048_v6  ;;  %1128 = vst [vmem:[#allocation3 + $0x208] sm:$0xff] %v1049_v55  ;;  %v868_v19 = vmul.f32 %v2111_v51, %v4015_v22  ;;  %v869_v25 = vmul.f32 %v2111_v51, %v4016_v45  ;;  %v1050_v24 = vadd.f32 %v3280_v30, %v956_v29 }
 0x21c   : > { %v1051_v10 = vadd.f32 %v3282_v63, %v957_v9  ;;  %v1052_v60 = vadd.f32 %v3284_v54, %v958_v58  ;;  %v1053_v33 = vadd.f32 %v3286_v41, %v959_v32  ;;  %v960_v48 = vmul.f32 %v3272_v52, %v866_v2 }
 0x21d   : > { %v961_v46 = vmul.f32 %v3274_v43, %v867_v59  ;;  %v962_v23 = vmul.f32 %v3276_v40, %v868_v19  ;;  %v963_v49 = vmul.f32 %v3278_v53, %v869_v25  ;;  %1092 = vst [vmem:[#allocation3 + $0xf0] sm:$0xff] %v1050_v24 }
 0x21e   : > { %v2113_v61 = vpop.eup %2112  ;;  %1093 = vst [vmem:[#allocation3 + $0xf8] sm:$0xff] %v1051_v10  ;;  %1129 = vst [vmem:[#allocation3 + $0x210] sm:$0xff] %v1052_v60  ;;  %v1054_v17 = vadd.f32 %v3280_v30, %v960_v48 }
 0x21f   : > { %1130 = vst [vmem:[#allocation3 + $0x218] sm:$0xff] %v1053_v33  ;;  %v870_v8 = vmul.f32 %v2113_v61, %v4017_v3  ;;  %v871_v27 = vmul.f32 %v2113_v61, %v4018_v15  ;;  %v872_v31 = vmul.f32 %v2113_v61, %v4019_v0  ;;  %v873_v57 = vmul.f32 %v2113_v61, %v4020_v11 }
 0x220   : > { %v1055_v42 = vadd.f32 %v3282_v63, %v961_v46  ;;  %v1056_v50 = vadd.f32 %v3284_v54, %v962_v23  ;;  %v1057_v5 = vadd.f32 %v3286_v41, %v963_v49  ;;  %1094 = vst [vmem:[#allocation3 + $0x100] sm:$0xff] %v1054_v17 }
 0x221   : > { %v964_v7 = vmul.f32 %v3272_v52, %v870_v8  ;;  %v965_v20 = vmul.f32 %v3274_v43, %v871_v27  ;;  %v966_v13 = vmul.f32 %v3276_v40, %v872_v31  ;;  %v967_v44 = vmul.f32 %v3278_v53, %v873_v57 }
 0x222   : > { %1095 = vst [vmem:[#allocation3 + $0x108] sm:$0xff] %v1055_v42  ;;  %1131 = vst [vmem:[#allocation3 + $0x220] sm:$0xff] %v1056_v50 }
 0x223   : > { %1132 = vst [vmem:[#allocation3 + $0x228] sm:$0xff] %v1057_v5  ;;  %v1058_v56 = vadd.f32 %v3280_v30, %v964_v7  ;;  %v1059_v39 = vadd.f32 %v3282_v63, %v965_v20  ;;  %v1060_v26 = vadd.f32 %v3284_v54, %v966_v13  ;;  %v1061_v36 = vadd.f32 %v3286_v41, %v967_v44 }
 0x225   : > { %1096 = vst [vmem:[#allocation3 + $0x110] sm:$0xff] %v1058_v56  ;;  %1097 = vst [vmem:[#allocation3 + $0x118] sm:$0xff] %v1059_v39 }
 0x226   : > { %1133 = vst [vmem:[#allocation3 + $0x230] sm:$0xff] %v1060_v26  ;;  %1134 = vst [vmem:[#allocation3 + $0x238] sm:$0xff] %v1061_v36 }
 0x227 PF: > { %p1840_p11 = scmp.ne.s32.totalorder %s2314_s24, 0 }
 0x228   : > { %v2339_v52 = vmov (!%p1840_p11), 0.0  }
 0x229   : > { %1137 = sbr.rel (%p1840_p11) target bundleno = 571 (0x23b), region = 60  ;;  %1138 = vst [vmem:[#allocation2] sm:$0xff] (!%p1840_p11), %v2339_v52  ;;  %1139 = vst [vmem:[#allocation2 + $0x8] sm:$0xff] (!%p1840_p11), %v2339_v52 }
 0x22a   : > { %1140 = vst [vmem:[#allocation2 + $0x10] sm:$0xff] (!%p1840_p11), %v2339_v52  ;;  %1141 = vst [vmem:[#allocation2 + $0x18] sm:$0xff] (!%p1840_p11), %v2339_v52 }
 0x22b   : > { %1142 = vst [vmem:[#allocation2 + $0x20] sm:$0xff] (!%p1840_p11), %v2339_v52  ;;  %1143 = vst [vmem:[#allocation2 + $0x28] sm:$0xff] (!%p1840_p11), %v2339_v52 }
 0x22c   : > { %1144 = vst [vmem:[#allocation2 + $0x30] sm:$0xff] (!%p1840_p11), %v2339_v52  ;;  %1145 = vst [vmem:[#allocation2 + $0x38] sm:$0xff] (!%p1840_p11), %v2339_v52 }
 0x22d   : > { %1146 = vst [vmem:[#allocation2 + $0x40] sm:$0xff] (!%p1840_p11), %v2339_v52  ;;  %1147 = vst [vmem:[#allocation2 + $0x48] sm:$0xff] (!%p1840_p11), %v2339_v52 }
 0x22e   : > { %1148 = vst [vmem:[#allocation2 + $0x50] sm:$0xff] (!%p1840_p11), %v2339_v52  ;;  %1149 = vst [vmem:[#allocation2 + $0x58] sm:$0xff] (!%p1840_p11), %v2339_v52 }
 0x22f   : > { %1150 = vst [vmem:[#allocation2 + $0x60] sm:$0xff] (!%p1840_p11), %v2339_v52  ;;  %1151 = vst [vmem:[#allocation2 + $0x68] sm:$0xff] (!%p1840_p11), %v2339_v52 }
 0x230   : > { %1152 = vst [vmem:[#allocation2 + $0x70] sm:$0xff] %v2339_v52  ;;  %1153 = vst [vmem:[#allocation2 + $0x78] sm:$0xff] %v2339_v52 }
 0x231   : > { %1154 = vst [vmem:[#allocation2 + $0x80] sm:$0xff] %v2339_v52  ;;  %1155 = vst [vmem:[#allocation2 + $0x88] sm:$0xff] %v2339_v52 }
 0x232   : > { %1156 = vst [vmem:[#allocation2 + $0x90] sm:$0xff] %v2339_v52  ;;  %1157 = vst [vmem:[#allocation2 + $0x98] sm:$0xff] %v2339_v52 }
 0x233   : > { %1158 = vst [vmem:[#allocation2 + $0xa0] sm:$0xff] %v2339_v52  ;;  %1159 = vst [vmem:[#allocation2 + $0xa8] sm:$0xff] %v2339_v52 }
 0x234   : > { %1160 = vst [vmem:[#allocation2 + $0xb0] sm:$0xff] %v2339_v52  ;;  %1161 = vst [vmem:[#allocation2 + $0xb8] sm:$0xff] %v2339_v52 }
 0x235   : > { %1162 = vst [vmem:[#allocation2 + $0xc0] sm:$0xff] %v2339_v52  ;;  %1163 = vst [vmem:[#allocation2 + $0xc8] sm:$0xff] %v2339_v52 }
 0x236   : > { %1164 = vst [vmem:[#allocation2 + $0xd0] sm:$0xff] %v2339_v52  ;;  %1165 = vst [vmem:[#allocation2 + $0xd8] sm:$0xff] %v2339_v52 }
 0x237   : > { %1166 = vst [vmem:[#allocation2 + $0xe0] sm:$0xff] %v2339_v52  ;;  %1167 = vst [vmem:[#allocation2 + $0xe8] sm:$0xff] %v2339_v52 }
 0x238   : > { %1168 = vst [vmem:[#allocation2 + $0xf0] sm:$0xff] %v2339_v52  ;;  %1169 = vst [vmem:[#allocation2 + $0xf8] sm:$0xff] %v2339_v52 }
 0x239   : > { %1170 = vst [vmem:[#allocation2 + $0x100] sm:$0xff] %v2339_v52  ;;  %1171 = vst [vmem:[#allocation2 + $0x108] sm:$0xff] %v2339_v52 }
 0x23a   : > { %1172 = vst [vmem:[#allocation2 + $0x110] sm:$0xff] %v2339_v52  ;;  %1173 = vst [vmem:[#allocation2 + $0x118] sm:$0xff] %v2339_v52 }
 0x23b PF: > { %v1250_v43 = vld [vmem:[%s2613_s15 + $0x8] sm:$0xff]  ;;  %v1252_v40 = vld [vmem:[%s2613_s15 + $0x18] sm:$0xff]  ;;  %v1249_v53 = vld [vmem:[%s2613_s15] sm:$0xff]  ;;  %s1848_s8 = smul.u32 288, %s2314_s24  ;;  %p1842_p1 = scmp.ne.s32.totalorder %s2314_s24, 1 }
 0x23c   : > { %v1850_v30 = vpack.c.bf16 %v1252_v40, %v1250_v43  ;;  %v1251_v63 = vld [vmem:[%s2613_s15 + $0x10] sm:$0xff]  ;;  %v1254_v54 = vld [vmem:[%s2613_s15 + $0x28] sm:$0xff]  ;;  %v1256_v41 = vld [vmem:[%s2613_s15 + $0x38] sm:$0xff] }
 0x23d   : > { %v1852_v16 = vpack.c.bf16 %v1251_v63, %v1249_v53  ;;  %v1854_v37 = vpack.c.bf16 %v1256_v41, %v1254_v54  ;;  %v1253_v1 = vld [vmem:[%s2613_s15 + $0x20] sm:$0xff]  ;;  %v1255_v47 = vld [vmem:[%s2613_s15 + $0x30] sm:$0xff]  ;;  %v1258_v4 = vld [vmem:[%s2613_s15 + $0x48] sm:$0xff]  ;;  %s3570_s14 = scalar_lea.vmem [#allocation3], %s1848_s8 }
 0x23e   : > { %1851 = vmatprep.subr.bf16.mxu0 %v1850_v30  ;;  %1914 = vmatprep.subr.bf16.mxu1 %v1850_v30  ;;  %v1260_v34 = vld [vmem:[%s2613_s15 + $0x58] sm:$0xff]  ;;  %v1856_v35 = vpack.c.bf16 %v1255_v47, %v1253_v1  ;;  %v1257_v55 = vld [vmem:[%s2613_s15 + $0x40] sm:$0xff]  ;;  %v1259_v28 = vld [vmem:[%s2613_s15 + $0x50] sm:$0xff] }
 0x23f   : > { %1853 = vmatpush1.bf16.msra.mxu0 %v1852_v16  ;;  %1930 = vmatpush1.bf16.msra.mxu1 %v1852_v16  ;;  %v1858_v6 = vpack.c.bf16 %v1260_v34, %v1258_v4  ;;  %v1262_v62 = vld [vmem:[%s2613_s15 + $0x68] sm:$0xff]  ;;  %v1264_v38 = vld [vmem:[%s2613_s15 + $0x78] sm:$0xff]  ;;  %v1860_v12 = vpack.c.bf16 %v1259_v28, %v1257_v55  ;;  %v1261_v51 = vld [vmem:[%s2613_s15 + $0x60] sm:$0xff] }
 0x240   : > { %1855 = vmatprep.subr.bf16.mxu0 %v1854_v37  ;;  %1915 = vmatprep.subr.bf16.mxu1 %v1854_v37  ;;  %v1862_v21 = vpack.c.bf16 %v1264_v38, %v1262_v62  ;;  %v1263_v29 = vld [vmem:[%s2613_s15 + $0x70] sm:$0xff]  ;;  %v1266_v9 = vld [vmem:[%s2613_s15 + $0x88] sm:$0xff]  ;;  %v1268_v58 = vld [vmem:[%s2613_s15 + $0x98] sm:$0xff] }
 0x241   : > { %v1864_v32 = vpack.c.bf16 %v1263_v29, %v1261_v51  ;;  %v1866_v61 = vpack.c.bf16 %v1268_v58, %v1266_v9  ;;  %v1265_v14 = vld [vmem:[%s2613_s15 + $0x80] sm:$0xff]  ;;  %v1267_v2 = vld [vmem:[%s2613_s15 + $0x90] sm:$0xff]  ;;  %v1270_v18 = vld [vmem:[%s2613_s15 + $0xa8] sm:$0xff] }
 0x242   : > { %v1272_v59 = vld [vmem:[%s2613_s15 + $0xb8] sm:$0xff]  ;;  %v1868_v22 = vpack.c.bf16 %v1267_v2, %v1265_v14  ;;  %v1269_v45 = vld [vmem:[%s2613_s15 + $0xa0] sm:$0xff]  ;;  %v1271_v25 = vld [vmem:[%s2613_s15 + $0xb0] sm:$0xff] }
 0x243   : > { %1857 = vmatpush1.bf16.msra.mxu0 %v1856_v35  ;;  %1931 = vmatpush1.bf16.msra.mxu1 %v1856_v35  ;;  %v1870_v19 = vpack.c.bf16 %v1272_v59, %v1270_v18  ;;  %v1274_v24 = vld [vmem:[%s2613_s15 + $0xc8] sm:$0xff]  ;;  %v1276_v10 = vld [vmem:[%s2613_s15 + $0xd8] sm:$0xff]  ;;  %v1872_v60 = vpack.c.bf16 %v1271_v25, %v1269_v45  ;;  %v1273_v33 = vld [vmem:[%s2613_s15 + $0xc0] sm:$0xff] }
 0x244   : > { %1859 = vmatprep.subr.bf16.mxu0 %v1858_v6  ;;  %1916 = vmatprep.subr.bf16.mxu1 %v1858_v6  ;;  %v1874_v48 = vpack.c.bf16 %v1276_v10, %v1274_v24  ;;  %v1275_v46 = vld [vmem:[%s2613_s15 + $0xd0] sm:$0xff]  ;;  %v1214_v23 = vld [vmem:[%s3570_s14 + $0x8] sm:$0xff]  ;;  %v1280_v8 = vld [vmem:[%s2613_s15 + $0xf8] sm:$0xff] }
 0x245   : > { %v1232_v49 = vld [vmem:[%s3570_s14 + $0x98] sm:$0xff]  ;;  %v1278_v3 = vld [vmem:[%s2613_s15 + $0xe8] sm:$0xff]  ;;  %1377 = vmatprep.mubr.f32.mxu0 %v1214_v23  ;;  %v1876_v15 = vpack.c.bf16 %v1275_v46, %v1273_v33  ;;  %v1277_v0 = vld [vmem:[%s2613_s15 + $0xe0] sm:$0xff] }
 0x246   : > { %1431 = vmatprep.mubr.f32.mxu1 %v1232_v49  ;;  %v1878_v27 = vpack.c.bf16 %v1280_v8, %v1278_v3  ;;  %v1279_v31 = vld [vmem:[%s2613_s15 + $0xf0] sm:$0xff]  ;;  %v1282_v11 = vld [vmem:[%s2613_s15 + $0x108] sm:$0xff]  ;;  %v1284_v57 = vld [vmem:[%s2613_s15 + $0x118] sm:$0xff] }
 0x247   : > { %1861 = vmatpush1.bf16.msra.mxu0 %v1860_v12  ;;  %1932 = vmatpush1.bf16.msra.mxu1 %v1860_v12  ;;  %v1880_v17 = vpack.c.bf16 %v1279_v31, %v1277_v0  ;;  %v1882_v42 = vpack.c.bf16 %v1284_v57, %v1282_v11  ;;  %v1281_v50 = vld [vmem:[%s2613_s15 + $0x100] sm:$0xff]  ;;  %v1283_v5 = vld [vmem:[%s2613_s15 + $0x110] sm:$0xff]  ;;  %v1286_v7 = vld [vmem:[%s2613_s15 + $0x128] sm:$0xff] }
 0x248   : > { %1863 = vmatprep.subr.bf16.mxu0 %v1862_v21  ;;  %1917 = vmatprep.subr.bf16.mxu1 %v1862_v21  ;;  %v1288_v20 = vld [vmem:[%s2613_s15 + $0x138] sm:$0xff]  ;;  %v1884_v13 = vpack.c.bf16 %v1283_v5, %v1281_v50  ;;  %v1285_v56 = vld [vmem:[%s2613_s15 + $0x120] sm:$0xff]  ;;  %v1287_v39 = vld [vmem:[%s2613_s15 + $0x130] sm:$0xff] }
 0x249   : > { %v1886_v44 = vpack.c.bf16 %v1288_v20, %v1286_v7  ;;  %v1290_v26 = vld [vmem:[%s2613_s15 + $0x148] sm:$0xff]  ;;  %v1292_v36 = vld [vmem:[%s2613_s15 + $0x158] sm:$0xff]  ;;  %v1888_v52 = vpack.c.bf16 %v1287_v39, %v1285_v56  ;;  %v1289_v40 = vld [vmem:[%s2613_s15 + $0x140] sm:$0xff] }
 0x24a   : > { %v1890_v43 = vpack.c.bf16 %v1292_v36, %v1290_v26  ;;  %v1291_v53 = vld [vmem:[%s2613_s15 + $0x150] sm:$0xff]  ;;  %v1294_v30 = vld [vmem:[%s2613_s15 + $0x168] sm:$0xff]  ;;  %v1296_v63 = vld [vmem:[%s2613_s15 + $0x178] sm:$0xff] }
 0x24b   : > { %1865 = vmatpush1.bf16.msra.mxu0 %v1864_v32  ;;  %1933 = vmatpush1.bf16.msra.mxu1 %v1864_v32  ;;  %v1892_v54 = vpack.c.bf16 %v1291_v53, %v1289_v40  ;;  %v1894_v41 = vpack.c.bf16 %v1296_v63, %v1294_v30  ;;  %v1293_v16 = vld [vmem:[%s2613_s15 + $0x160] sm:$0xff]  ;;  %v1295_v37 = vld [vmem:[%s2613_s15 + $0x170] sm:$0xff]  ;;  %v1298_v1 = vld [vmem:[%s2613_s15 + $0x188] sm:$0xff] }
 0x24c   : > { %1867 = vmatprep.subr.bf16.mxu0 %v1866_v61  ;;  %1918 = vmatprep.subr.bf16.mxu1 %v1866_v61  ;;  %v1300_v47 = vld [vmem:[%s2613_s15 + $0x198] sm:$0xff]  ;;  %v1896_v4 = vpack.c.bf16 %v1295_v37, %v1293_v16  ;;  %v1297_v35 = vld [vmem:[%s2613_s15 + $0x180] sm:$0xff]  ;;  %v1299_v6 = vld [vmem:[%s2613_s15 + $0x190] sm:$0xff] }
 0x24d   : > { %v1898_v34 = vpack.c.bf16 %v1300_v47, %v1298_v1  ;;  %v1302_v55 = vld [vmem:[%s2613_s15 + $0x1a8] sm:$0xff]  ;;  %v1304_v28 = vld [vmem:[%s2613_s15 + $0x1b8] sm:$0xff]  ;;  %v1900_v62 = vpack.c.bf16 %v1299_v6, %v1297_v35  ;;  %v1301_v12 = vld [vmem:[%s2613_s15 + $0x1a0] sm:$0xff] }
 0x24e   : > { %v1902_v38 = vpack.c.bf16 %v1304_v28, %v1302_v55  ;;  %v1303_v21 = vld [vmem:[%s2613_s15 + $0x1b0] sm:$0xff]  ;;  %v1306_v51 = vld [vmem:[%s2613_s15 + $0x1c8] sm:$0xff]  ;;  %v1308_v29 = vld [vmem:[%s2613_s15 + $0x1d8] sm:$0xff] }
 0x24f   : > { %1869 = vmatpush1.bf16.msra.mxu0 %v1868_v22  ;;  %1934 = vmatpush1.bf16.msra.mxu1 %v1868_v22  ;;  %v1904_v9 = vpack.c.bf16 %v1303_v21, %v1301_v12  ;;  %v1906_v58 = vpack.c.bf16 %v1308_v29, %v1306_v51  ;;  %v1305_v32 = vld [vmem:[%s2613_s15 + $0x1c0] sm:$0xff]  ;;  %v1307_v61 = vld [vmem:[%s2613_s15 + $0x1d0] sm:$0xff]  ;;  %v1310_v14 = vld [vmem:[%s2613_s15 + $0x1e8] sm:$0xff] }
 0x250   : > { %1871 = vmatprep.subr.bf16.mxu0 %v1870_v19  ;;  %1919 = vmatprep.subr.bf16.mxu1 %v1870_v19  ;;  %v1312_v2 = vld [vmem:[%s2613_s15 + $0x1f8] sm:$0xff]  ;;  %v1908_v18 = vpack.c.bf16 %v1307_v61, %v1305_v32  ;;  %v1309_v22 = vld [vmem:[%s2613_s15 + $0x1e0] sm:$0xff]  ;;  %v1311_v19 = vld [vmem:[%s2613_s15 + $0x1f0] sm:$0xff] }
 0x251   : > { %v1910_v59 = vpack.c.bf16 %v1312_v2, %v1310_v14  ;;  %v1912_v45 = vpack.c.bf16 %v1311_v19, %v1309_v22  ;;  %v1213_v25 = vld [vmem:[%s3570_s14] sm:$0xff]  ;;  %v1231_v24 = vld [vmem:[%s3570_s14 + $0x90] sm:$0xff]  ;;  %v1216_v10 = vld [vmem:[%s3570_s14 + $0x18] sm:$0xff] }
 0x252   : > { %v1215_v33 = vld [vmem:[%s3570_s14 + $0x10] sm:$0xff]  ;;  %v1218_v46 = vld [vmem:[%s3570_s14 + $0x28] sm:$0xff]  ;;  %v1236_v23 = vld [vmem:[%s3570_s14 + $0xb8] sm:$0xff] }
 0x253   : > { %1873 = vmatpush1.bf16.msra.mxu0 %v1872_v60  ;;  %1935 = vmatpush1.bf16.msra.mxu1 %v1872_v60  ;;  %v1234_v60 = vld [vmem:[%s3570_s14 + $0xa8] sm:$0xff]  ;;  %v1217_v49 = vld [vmem:[%s3570_s14 + $0x20] sm:$0xff]  ;;  %v1235_v3 = vld [vmem:[%s3570_s14 + $0xb0] sm:$0xff] }
 0x254   : > { %1875 = vmatprep.subr.bf16.mxu0 %v1874_v48  ;;  %1920 = vmatprep.subr.bf16.mxu1 %v1874_v48  ;;  %v1233_v48 = vld [vmem:[%s3570_s14 + $0xa0] sm:$0xff]  ;;  %v1220_v8 = vld [vmem:[%s3570_s14 + $0x38] sm:$0xff]  ;;  %v1222_v31 = vld [vmem:[%s3570_s14 + $0x48] sm:$0xff] }
 0x255   : > { %v1237_v0 = vld [vmem:[%s3570_s14 + $0xc0] sm:$0xff]  ;;  %v1240_v11 = vld [vmem:[%s3570_s14 + $0xd8] sm:$0xff]  ;;  %v1242_v50 = vld [vmem:[%s3570_s14 + $0xe8] sm:$0xff] }
 0x256   : > { %v1221_v57 = vld [vmem:[%s3570_s14 + $0x40] sm:$0xff]  ;;  %v1223_v5 = vld [vmem:[%s3570_s14 + $0x50] sm:$0xff]  ;;  %v1226_v20 = vld [vmem:[%s3570_s14 + $0x68] sm:$0xff] }
 0x257   : > { %1877 = vmatpush1.bf16.msra.mxu0 %v1876_v15  ;;  %1936 = vmatpush1.bf16.msra.mxu1 %v1876_v15  ;;  %v1238_v15 = vld [vmem:[%s3570_s14 + $0xc8] sm:$0xff]  ;;  %v1241_v7 = vld [vmem:[%s3570_s14 + $0xe0] sm:$0xff]  ;;  %v1243_v56 = vld [vmem:[%s3570_s14 + $0xf0] sm:$0xff] }
 0x258   : > { %1879 = vmatprep.subr.bf16.mxu0 %v1878_v27  ;;  %1921 = vmatprep.subr.bf16.mxu1 %v1878_v27  ;;  %v1219_v27 = vld [vmem:[%s3570_s14 + $0x30] sm:$0xff]  ;;  %v1228_v39 = vld [vmem:[%s3570_s14 + $0x78] sm:$0xff]  ;;  %v1246_v26 = vld [vmem:[%s3570_s14 + $0x108] sm:$0xff] }
 0x259   : > { %v1227_v36 = vld [vmem:[%s3570_s14 + $0x70] sm:$0xff]  ;;  %v1248_v40 = vld [vmem:[%s3570_s14 + $0x118] sm:$0xff]  ;;  %v1229_v53 = vld [vmem:[%s3570_s14 + $0x80] sm:$0xff] }
 0x25a   : > { %v1247_v30 = vld [vmem:[%s3570_s14 + $0x110] sm:$0xff]  ;;  %v1174_v63 = vld [vmem:[#allocation2] sm:$0xff]  ;;  %v1193_v16 = vld [vmem:[#allocation2 + $0x98] sm:$0xff] }
 0x25b   : > { %1881 = vmatpush1.bf16.msra.mxu0 %v1880_v17  ;;  %1937 = vmatpush1.bf16.msra.mxu1 %v1880_v17  ;;  %v1239_v17 = vld [vmem:[%s3570_s14 + $0xd0] sm:$0xff]  ;;  %v1195_v12 = vld [vmem:[#allocation2 + $0xa8] sm:$0xff]  ;;  %v1178_v2 = vld [vmem:[#allocation2 + $0x20] sm:$0xff] }
 0x25c   : > { %1883 = vmatprep.subr.bf16.mxu0 %v1882_v42  ;;  %1922 = vmatprep.subr.bf16.mxu1 %v1882_v42  ;;  %v1224_v42 = vld [vmem:[%s3570_s14 + $0x58] sm:$0xff]  ;;  %v1176_v28 = vld [vmem:[#allocation2 + $0x10] sm:$0xff] }
 0x25d   : > { %v1197_v22 = vld [vmem:[#allocation2 + $0xb8] sm:$0xff] }
 0x25f   : > { %1885 = vmatpush1.bf16.msra.mxu0 %v1884_v13  ;;  %1938 = vmatpush1.bf16.msra.mxu1 %v1884_v13  ;;  %v1244_v13 = vld [vmem:[%s3570_s14 + $0xf8] sm:$0xff] }
 0x260   : > { %1887 = vmatprep.subr.bf16.mxu0 %v1886_v44  ;;  %1923 = vmatprep.subr.bf16.mxu1 %v1886_v44  ;;  %v1225_v44 = vld [vmem:[%s3570_s14 + $0x60] sm:$0xff] }
 0x263   : > { %1889 = vmatpush1.bf16.msra.mxu0 %v1888_v52  ;;  %1939 = vmatpush1.bf16.msra.mxu1 %v1888_v52  ;;  %v1245_v52 = vld [vmem:[%s3570_s14 + $0x100] sm:$0xff] }
 0x264   : > { %1891 = vmatprep.subr.bf16.mxu0 %v1890_v43  ;;  %1924 = vmatprep.subr.bf16.mxu1 %v1890_v43  ;;  %v1230_v43 = vld [vmem:[%s3570_s14 + $0x88] sm:$0xff] }
 0x267   : > { %1893 = vmatpush1.bf16.msra.mxu0 %v1892_v54  ;;  %1940 = vmatpush1.bf16.msra.mxu1 %v1892_v54  ;;  %v1192_v54 = vld [vmem:[#allocation2 + $0x90] sm:$0xff] }
 0x268   : > { %1895 = vmatprep.subr.bf16.mxu0 %v1894_v41  ;;  %1925 = vmatprep.subr.bf16.mxu1 %v1894_v41  ;;  %v1175_v41 = vld [vmem:[#allocation2 + $0x8] sm:$0xff] }
 0x26b   : > { %1897 = vmatpush1.bf16.msra.mxu0 %v1896_v4  ;;  %1941 = vmatpush1.bf16.msra.mxu1 %v1896_v4 }
 0x26c   : > { %1899 = vmatprep.subr.bf16.mxu0 %v1898_v34  ;;  %1926 = vmatprep.subr.bf16.mxu1 %v1898_v34 }
 0x26f   : > { %1901 = vmatpush1.bf16.msra.mxu0 %v1900_v62  ;;  %1942 = vmatpush1.bf16.msra.mxu1 %v1900_v62  ;;  %v1194_v62 = vld [vmem:[#allocation2 + $0xa0] sm:$0xff] }
 0x270   : > { %1903 = vmatprep.subr.bf16.mxu0 %v1902_v38  ;;  %1927 = vmatprep.subr.bf16.mxu1 %v1902_v38  ;;  %v1177_v38 = vld [vmem:[#allocation2 + $0x18] sm:$0xff] }
 0x273   : > { %1905 = vmatpush1.bf16.msra.mxu0 %v1904_v9  ;;  %1943 = vmatpush1.bf16.msra.mxu1 %v1904_v9 }
 0x274   : > { %1907 = vmatprep.subr.bf16.mxu0 %v1906_v58  ;;  %1928 = vmatprep.subr.bf16.mxu1 %v1906_v58 }
 0x277   : > { %1909 = vmatpush1.bf16.msra.mxu0 %v1908_v18  ;;  %1944 = vmatpush1.bf16.msra.mxu1 %v1908_v18  ;;  %v1196_v18 = vld [vmem:[#allocation2 + $0xb0] sm:$0xff] }
 0x278   : > { %1911 = vmatprep.subr.bf16.mxu0 %v1910_v59  ;;  %1929 = vmatprep.subr.bf16.mxu1 %v1910_v59  ;;  %v1179_v59 = vld [vmem:[#allocation2 + $0x28] sm:$0xff] }
 0x27b   : > { %1913 = vmatpush1.bf16.msra.mxu0 %v1912_v45  ;;  %1945 = vmatpush1.bf16.msra.mxu1 %v1912_v45 }
 0x27e   : > { %1378 = vmatmul.mubr.f32.vlgmr.msra.gmra.mrb[0].mxu0 %v1213_v25  ;;  %1432 = vmatmul.mubr.f32.vlgmr.msra.gmra.mrb[0].mxu1 %v1231_v24 }
 0x27f   : > { %1383 = vmatprep.mubr.f32.mxu0 %v1216_v10  ;;  %1437 = vmatprep.mubr.f32.mxu1 %v1234_v60 }
 0x282   : > { %1384 = vmatmul.mubr.f32.gmra.mrb[2].mxu0 %v1215_v33  ;;  %1438 = vmatmul.mubr.f32.gmra.mrb[2].mxu1 %v1233_v48 }
 0x283   : > { %1389 = vmatprep.mubr.f32.mxu0 %v1218_v46  ;;  %1443 = vmatprep.mubr.f32.mxu1 %v1236_v23  ;;  %v1180_v46 = vld [vmem:[#allocation2 + $0x30] sm:$0xff]  ;;  %v1198_v23 = vld [vmem:[#allocation2 + $0xc0] sm:$0xff] }
 0x286   : > { %1390 = vmatmul.mubr.f32.gmra.mrb[4].mxu0 %v1217_v49  ;;  %1444 = vmatmul.mubr.f32.gmra.mrb[4].mxu1 %v1235_v3  ;;  %v1181_v49 = vld [vmem:[#allocation2 + $0x38] sm:$0xff]  ;;  %v1199_v3 = vld [vmem:[#allocation2 + $0xc8] sm:$0xff] }
 0x287   : > { %1395 = vmatprep.mubr.f32.mxu0 %v1220_v8  ;;  %1449 = vmatprep.mubr.f32.mxu1 %v1238_v15 }
 0x28a   : > { %1396 = vmatmul.mubr.f32.gmra.mrb[6].mxu0 %v1219_v27  ;;  %1450 = vmatmul.mubr.f32.gmra.mrb[6].mxu1 %v1237_v0 }
 0x28b   : > { %1401 = vmatprep.mubr.f32.mxu0 %v1222_v31  ;;  %1455 = vmatprep.mubr.f32.mxu1 %v1240_v11 }
 0x28e   : > { %1402 = vmatmul.mubr.f32.gmra.mrb[8].mxu0 %v1221_v57  ;;  %1456 = vmatmul.mubr.f32.gmra.mrb[8].mxu1 %v1239_v17 }
 0x28f   : > { %1407 = vmatprep.mubr.f32.mxu0 %v1224_v42  ;;  %1461 = vmatprep.mubr.f32.mxu1 %v1242_v50  ;;  %v1182_v42 = vld [vmem:[#allocation2 + $0x40] sm:$0xff]  ;;  %v1200_v50 = vld [vmem:[#allocation2 + $0xd0] sm:$0xff] }
 0x292   : > { %1408 = vmatmul.mubr.f32.gmra.mrb[10].mxu0 %v1223_v5  ;;  %1462 = vmatmul.mubr.f32.gmra.mrb[10].mxu1 %v1241_v7  ;;  %v1183_v5 = vld [vmem:[#allocation2 + $0x48] sm:$0xff]  ;;  %v1201_v7 = vld [vmem:[#allocation2 + $0xd8] sm:$0xff] }
 0x293   : > { %1413 = vmatprep.mubr.f32.mxu0 %v1226_v20  ;;  %1467 = vmatprep.mubr.f32.mxu1 %v1244_v13 }
 0x296   : > { %1414 = vmatmul.mubr.f32.gmra.mrb[12].mxu0 %v1225_v44  ;;  %1468 = vmatmul.mubr.f32.gmra.mrb[12].mxu1 %v1243_v56 }
 0x297   : > { %1419 = vmatprep.mubr.f32.mxu0 %v1228_v39  ;;  %1473 = vmatprep.mubr.f32.mxu1 %v1246_v26 }
 0x29a   : > { %1420 = vmatmul.mubr.f32.gmra.mrb[14].mxu0 %v1227_v36  ;;  %1474 = vmatmul.mubr.f32.gmra.mrb[14].mxu1 %v1245_v52 }
 0x29b   : > { %1425 = vmatprep.mubr.f32.mxu0 %v1230_v43  ;;  %1479 = vmatprep.mubr.f32.mxu1 %v1248_v40  ;;  %v1184_v43 = vld [vmem:[#allocation2 + $0x50] sm:$0xff]  ;;  %v1202_v40 = vld [vmem:[#allocation2 + $0xe0] sm:$0xff] }
 0x29e   : > { %1426 = vmatmul.mubr.f32.gmra.mrb[16].mxu0 %v1229_v53  ;;  %1480 = vmatmul.mubr.f32.gmra.mrb[16].mxu1 %v1247_v30  ;;  %v1185_v53 = vld [vmem:[#allocation2 + $0x58] sm:$0xff]  ;;  %v1203_v30 = vld [vmem:[#allocation2 + $0xe8] sm:$0xff] }
 0x351   : > { %v1379_v37 = vpop.f32.mrb[0].mxu0  ;;  %v1433_v1 = vpop.f32.mrb[0].mxu1 }
 0x352   : > { %v1486_v47 = vadd.f32 %v1379_v37, %v1174_v63  ;;  %v1504_v4 = vadd.f32 %v1433_v1, %v1192_v54  ;;  %v1381_v34 = vpop.f32.mrb[1].mxu0  ;;  %v1435_v35 = vpop.f32.mrb[1].mxu1 }
 0x353   : > { %v1487_v6 = vadd.f32 %v1381_v34, %v1175_v41  ;;  %v1505_v55 = vadd.f32 %v1435_v35, %v1193_v16  ;;  %v1186_v34 = vld [vmem:[#allocation2 + $0x60] sm:$0xff]  ;;  %v1204_v35 = vld [vmem:[#allocation2 + $0xf0] sm:$0xff] }
 0x354   : > { %1522 = vst [vmem:[#allocation2] sm:$0xff] %v1486_v47  ;;  %1540 = vst [vmem:[#allocation2 + $0x90] sm:$0xff] %v1504_v4 }
 0x355   : > { %1523 = vst [vmem:[#allocation2 + $0x8] sm:$0xff] %v1487_v6  ;;  %1541 = vst [vmem:[#allocation2 + $0x98] sm:$0xff] %v1505_v55  ;;  %v1385_v21 = vpop.f32.mrb[2].mxu0  ;;  %v1439_v51 = vpop.f32.mrb[2].mxu1  ;;  %v1187_v6 = vld [vmem:[#allocation2 + $0x68] sm:$0xff]  ;;  %v1205_v55 = vld [vmem:[#allocation2 + $0xf8] sm:$0xff] }
 0x356   : > { %v1488_v29 = vadd.f32 %v1385_v21, %v1176_v28  ;;  %v1506_v9 = vadd.f32 %v1439_v51, %v1194_v62  ;;  %v1387_v58 = vpop.f32.mrb[3].mxu0  ;;  %v1441_v32 = vpop.f32.mrb[3].mxu1 }
 0x357   : > { %v1489_v61 = vadd.f32 %v1387_v58, %v1177_v38  ;;  %v1507_v14 = vadd.f32 %v1441_v32, %v1195_v12  ;;  %v1188_v58 = vld [vmem:[#allocation2 + $0x70] sm:$0xff]  ;;  %v1206_v32 = vld [vmem:[#allocation2 + $0x100] sm:$0xff] }
 0x358   : > { %1524 = vst [vmem:[#allocation2 + $0x10] sm:$0xff] %v1488_v29  ;;  %1542 = vst [vmem:[#allocation2 + $0xa0] sm:$0xff] %v1506_v9 }
 0x359   : > { %1525 = vst [vmem:[#allocation2 + $0x18] sm:$0xff] %v1489_v61  ;;  %1543 = vst [vmem:[#allocation2 + $0xa8] sm:$0xff] %v1507_v14  ;;  %v1391_v19 = vpop.f32.mrb[4].mxu0  ;;  %v1445_v45 = vpop.f32.mrb[4].mxu1  ;;  %v1189_v61 = vld [vmem:[#allocation2 + $0x78] sm:$0xff]  ;;  %v1207_v14 = vld [vmem:[#allocation2 + $0x108] sm:$0xff] }
 0x35a   : > { %v1490_v25 = vadd.f32 %v1391_v19, %v1178_v2  ;;  %v1508_v24 = vadd.f32 %v1445_v45, %v1196_v18  ;;  %v1393_v10 = vpop.f32.mrb[5].mxu0  ;;  %v1447_v60 = vpop.f32.mrb[5].mxu1 }
 0x35b   : > { %v1491_v33 = vadd.f32 %v1393_v10, %v1179_v59  ;;  %v1509_v48 = vadd.f32 %v1447_v60, %v1197_v22  ;;  %v1190_v10 = vld [vmem:[#allocation2 + $0x80] sm:$0xff]  ;;  %v1208_v60 = vld [vmem:[#allocation2 + $0x110] sm:$0xff] }
 0x35c   : > { %1526 = vst [vmem:[#allocation2 + $0x20] sm:$0xff] %v1490_v25  ;;  %1544 = vst [vmem:[#allocation2 + $0xb0] sm:$0xff] %v1508_v24 }
 0x35d   : > { %1527 = vst [vmem:[#allocation2 + $0x28] sm:$0xff] %v1491_v33  ;;  %1545 = vst [vmem:[#allocation2 + $0xb8] sm:$0xff] %v1509_v48  ;;  %v1397_v8 = vpop.f32.mrb[6].mxu0  ;;  %v1451_v15 = vpop.f32.mrb[6].mxu1  ;;  %v1191_v33 = vld [vmem:[#allocation2 + $0x88] sm:$0xff]  ;;  %v1209_v48 = vld [vmem:[#allocation2 + $0x118] sm:$0xff] }
 0x35e   : > { %v1492_v27 = vadd.f32 %v1397_v8, %v1180_v46  ;;  %v1510_v0 = vadd.f32 %v1451_v15, %v1198_v23  ;;  %v1399_v31 = vpop.f32.mrb[7].mxu0  ;;  %v1453_v11 = vpop.f32.mrb[7].mxu1 }
 0x35f   : > { %v1493_v57 = vadd.f32 %v1399_v31, %v1181_v49  ;;  %v1511_v17 = vadd.f32 %v1453_v11, %v1199_v3  ;;  %v1600_v31 = vlaneseq (!%p1842_p1)  ;;  %v1598_v11 = vld [vmem:[%s323_s18] sm:$0x3] (!%p1842_p1) }
 0x360   : > { %1528 = vst [vmem:[#allocation2 + $0x30] sm:$0xff] %v1492_v27  ;;  %1546 = vst [vmem:[#allocation2 + $0xc0] sm:$0xff] %v1510_v0 }
 0x361   : > { %1529 = vst [vmem:[#allocation2 + $0x38] sm:$0xff] %v1493_v57  ;;  %1547 = vst [vmem:[#allocation2 + $0xc8] sm:$0xff] %v1511_v17  ;;  %v1403_v20 = vpop.f32.mrb[8].mxu0  ;;  %v1457_v13 = vpop.f32.mrb[8].mxu1  ;;  %v1601_v57 = vshrl.u32 (!%p1842_p1), %v1600_v31, 7  ;;  %v1562_v17 = vld [vmem:[#allocation2] sm:$0xff] (!%p1842_p1) }
 0x362   : > { %v1494_v44 = vadd.f32 %v1403_v20, %v1182_v42  ;;  %v1512_v56 = vadd.f32 %v1457_v13, %v1200_v50  ;;  %v1405_v39 = vpop.f32.mrb[9].mxu0  ;;  %v1459_v26 = vpop.f32.mrb[9].mxu1  ;;  %v1563_v42 = vld [vmem:[#allocation2 + $0x8] sm:$0xff] (!%p1842_p1)  ;;  %v1564_v50 = vld [vmem:[#allocation2 + $0x10] sm:$0xff] (!%p1842_p1) }
 0x363   : > { %v1495_v36 = vadd.f32 %v1405_v39, %v1183_v5  ;;  %v1513_v52 = vadd.f32 %v1459_v26, %v1201_v7  ;;  %v1565_v5 = vld [vmem:[#allocation2 + $0x18] sm:$0xff] (!%p1842_p1)  ;;  %v1602_v7 = vsub.s32 (!%p1842_p1), 0, %v1601_v57  ;;  %v1606_v20 = vsub.s32 (!%p1842_p1), 1, %v1601_v57  ;;  %v1566_v13 = vld [vmem:[#allocation2 + $0x20] sm:$0xff] (!%p1842_p1) }
 0x364   : > { %1530 = vst [vmem:[#allocation2 + $0x40] sm:$0xff] %v1494_v44  ;;  %1548 = vst [vmem:[#allocation2 + $0xd0] sm:$0xff] %v1512_v56  ;;  %v1567_v44 = vld [vmem:[#allocation2 + $0x28] sm:$0xff] (!%p1842_p1) }
 0x365   : > { %1531 = vst [vmem:[#allocation2 + $0x48] sm:$0xff] %v1495_v36  ;;  %1549 = vst [vmem:[#allocation2 + $0xd8] sm:$0xff] %v1513_v52  ;;  %v1409_v63 = vpop.f32.mrb[10].mxu0  ;;  %v1463_v54 = vpop.f32.mrb[10].mxu1 }
 0x366   : > { %v1496_v41 = vadd.f32 %v1409_v63, %v1184_v43  ;;  %v1514_v16 = vadd.f32 %v1463_v54, %v1202_v40  ;;  %v1411_v37 = vpop.f32.mrb[11].mxu0  ;;  %v1465_v1 = vpop.f32.mrb[11].mxu1  ;;  %v3650_v40 = vrot.slane (!%p1842_p1), %v1598_v11, %v1602_v7 }
 0x367   : > { %v1497_v47 = vadd.f32 %v1411_v37, %v1185_v53  ;;  %v1515_v4 = vadd.f32 %v1465_v1, %v1203_v30  ;;  %v1568_v56 = vld [vmem:[#allocation2 + $0x30] sm:$0xff] (!%p1842_p1)  ;;  %v3652_v53 = vrot.slane (!%p1842_p1), %v1598_v11, %v1606_v20 }
 0x368   : > { %1532 = vst [vmem:[#allocation2 + $0x50] sm:$0xff] %v1496_v41  ;;  %1550 = vst [vmem:[#allocation2 + $0xe0] sm:$0xff] %v1514_v16  ;;  %v1569_v39 = vld [vmem:[#allocation2 + $0x38] sm:$0xff] (!%p1842_p1)  ;;  %v1610_v1 = vadd.f32 (!%p1842_p1), %v3650_v40, %v1562_v17 }
 0x369   : > { %1533 = vst [vmem:[#allocation2 + $0x58] sm:$0xff] %v1497_v47  ;;  %1551 = vst [vmem:[#allocation2 + $0xe8] sm:$0xff] %v1515_v4  ;;  %v1415_v28 = vpop.f32.mrb[12].mxu0  ;;  %v1469_v62 = vpop.f32.mrb[12].mxu1  ;;  %v1611_v47 = vadd.f32 (!%p1842_p1), %v3652_v53, %v1563_v42  ;;  %v1612_v4 = vadd.f32 (!%p1842_p1), %v3650_v40, %v1564_v50 }
 0x36a   : > { %v1498_v38 = vadd.f32 %v1415_v28, %v1186_v34  ;;  %v1516_v12 = vadd.f32 %v1469_v62, %v1204_v35  ;;  %v1417_v21 = vpop.f32.mrb[13].mxu0  ;;  %v1471_v51 = vpop.f32.mrb[13].mxu1  ;;  %v1613_v34 = vadd.f32 (!%p1842_p1), %v3652_v53, %v1565_v5  ;;  %v1580_v35 = vld [vmem:[#allocation2 + $0x90] sm:$0xff] (!%p1842_p1)  ;;  %v1614_v28 = vadd.f32 (!%p1842_p1), %v3650_v40, %v1566_v13  ;;  %1646 = vst [vmem:[%s2631_s10] sm:$0xff] (!%p1842_p1), %v1610_v1 }
 0x36b   : > { %v1499_v29 = vadd.f32 %v1417_v21, %v1187_v6  ;;  %v1517_v9 = vadd.f32 %v1471_v51, %v1205_v55  ;;  %v1570_v26 = vld [vmem:[#allocation2 + $0x40] sm:$0xff] (!%p1842_p1)  ;;  %v1581_v6 = vld [vmem:[#allocation2 + $0x98] sm:$0xff] (!%p1842_p1)  ;;  %v1615_v62 = vadd.f32 (!%p1842_p1), %v3652_v53, %v1567_v44  ;;  %v1583_v21 = vld [vmem:[#allocation2 + $0xa8] sm:$0xff] (!%p1842_p1)  ;;  %1647 = vst [vmem:[%s2631_s10 + $0x8] sm:$0xff] (!%p1842_p1), %v1611_v47 }
 0x36c   : > { %1534 = vst [vmem:[#allocation2 + $0x60] sm:$0xff] %v1498_v38  ;;  %1552 = vst [vmem:[#allocation2 + $0xf0] sm:$0xff] %v1516_v12  ;;  %v1571_v36 = vld [vmem:[#allocation2 + $0x48] sm:$0xff] (!%p1842_p1)  ;;  %v1582_v55 = vld [vmem:[#allocation2 + $0xa0] sm:$0xff] (!%p1842_p1)  ;;  %v1616_v38 = vadd.f32 (!%p1842_p1), %v3650_v40, %v1568_v56  ;;  %v1617_v12 = vadd.f32 (!%p1842_p1), %v3652_v53, %v1569_v39 }
 0x36d   : > { %1535 = vst [vmem:[#allocation2 + $0x68] sm:$0xff] %v1499_v29  ;;  %1553 = vst [vmem:[#allocation2 + $0xf8] sm:$0xff] %v1517_v9  ;;  %v1421_v2 = vpop.f32.mrb[14].mxu0  ;;  %v1475_v18 = vpop.f32.mrb[14].mxu1  ;;  %v1584_v51 = vld [vmem:[#allocation2 + $0xb0] sm:$0xff] (!%p1842_p1)  ;;  %v1585_v29 = vld [vmem:[#allocation2 + $0xb8] sm:$0xff] (!%p1842_p1)  ;;  %v1618_v9 = vadd.f32 (!%p1842_p1), %v3650_v40, %v1570_v26 }
 0x36e   : > { %v1500_v59 = vadd.f32 %v1421_v2, %v1188_v58  ;;  %v1518_v22 = vadd.f32 %v1475_v18, %v1206_v32  ;;  %v1423_v19 = vpop.f32.mrb[15].mxu0  ;;  %v1477_v45 = vpop.f32.mrb[15].mxu1  ;;  %1648 = vst [vmem:[%s2631_s10 + $0x10] sm:$0xff] (!%p1842_p1), %v1612_v4  ;;  %1649 = vst [vmem:[%s2631_s10 + $0x18] sm:$0xff] (!%p1842_p1), %v1613_v34  ;;  %v1619_v58 = vadd.f32 (!%p1842_p1), %v3652_v53, %v1571_v36  ;;  %v1587_v2 = vld [vmem:[#allocation2 + $0xc8] sm:$0xff] (!%p1842_p1)  ;;  %v1588_v18 = vld [vmem:[#allocation2 + $0xd0] sm:$0xff] (!%p1842_p1) }
 0x36f   : > { %v1501_v25 = vadd.f32 %v1423_v19, %v1189_v61  ;;  %v1519_v24 = vadd.f32 %v1477_v45, %v1207_v14  ;;  %1561 = sbr.rel (%p1842_p1) target bundleno = 899 (0x383), region = 64  ;;  %v1572_v52 = vld [vmem:[#allocation2 + $0x50] sm:$0xff] (!%p1842_p1)  ;;  %v1586_v14 = vld [vmem:[#allocation2 + $0xc0] sm:$0xff] (!%p1842_p1)  ;;  %1650 = vst [vmem:[%s2631_s10 + $0x20] sm:$0xff] (!%p1842_p1), %v1614_v28  ;;  %1651 = vst [vmem:[%s2631_s10 + $0x28] sm:$0xff] (!%p1842_p1), %v1615_v62  ;;  %v1635_v42 = vadd.f32 (!%p1842_p1), %v3652_v53, %v1587_v2 }
 0x370   : > { %1536 = vst [vmem:[#allocation2 + $0x70] sm:$0xff] %v1500_v59  ;;  %1554 = vst [vmem:[#allocation2 + $0x100] sm:$0xff] %v1518_v22  ;;  %v1573_v43 = vld [vmem:[#allocation2 + $0x58] sm:$0xff] (!%p1842_p1)  ;;  %v1620_v32 = vadd.f32 (!%p1842_p1), %v3650_v40, %v1572_v52  ;;  %v1634_v17 = vadd.f32 (!%p1842_p1), %v3650_v40, %v1586_v14  ;;  %v1636_v50 = vadd.f32 (!%p1842_p1), %v3650_v40, %v1588_v18 }
 0x371   : > { %1537 = vst [vmem:[#allocation2 + $0x78] sm:$0xff] %v1501_v25  ;;  %1555 = vst [vmem:[#allocation2 + $0x108] sm:$0xff] %v1519_v24  ;;  %v1427_v46 = vpop.f32.mrb[16].mxu0  ;;  %v1481_v23 = vpop.f32.mrb[16].mxu1  ;;  %v1621_v61 = vadd.f32 (!%p1842_p1), %v3652_v53, %v1573_v43  ;;  %v1589_v25 = vld [vmem:[#allocation2 + $0xd8] sm:$0xff] (!%p1842_p1)  ;;  %v1590_v24 = vld [vmem:[#allocation2 + $0xe0] sm:$0xff] (!%p1842_p1) }
 0x372   : > { %v1502_v49 = vadd.f32 %v1427_v46, %v1190_v10  ;;  %v1520_v3 = vadd.f32 %v1481_v23, %v1208_v60  ;;  %v1429_v8 = vpop.f32.mrb[17].mxu0  ;;  %v1483_v15 = vpop.f32.mrb[17].mxu1  ;;  %1652 = vst [vmem:[%s2631_s10 + $0x30] sm:$0xff] (!%p1842_p1), %v1616_v38  ;;  %1653 = vst [vmem:[%s2631_s10 + $0x38] sm:$0xff] (!%p1842_p1), %v1617_v12  ;;  %v1591_v10 = vld [vmem:[#allocation2 + $0xe8] sm:$0xff] (!%p1842_p1)  ;;  %v1629_v46 = vadd.f32 (!%p1842_p1), %v3652_v53, %v1581_v6 }
 0x373   : > { %v1503_v27 = vadd.f32 %v1429_v8, %v1191_v33  ;;  %v1521_v0 = vadd.f32 %v1483_v15, %v1209_v48  ;;  %v1574_v30 = vld [vmem:[#allocation2 + $0x60] sm:$0xff] (!%p1842_p1)  ;;  %1654 = vst [vmem:[%s2631_s10 + $0x40] sm:$0xff] (!%p1842_p1), %v1618_v9  ;;  %1655 = vst [vmem:[%s2631_s10 + $0x48] sm:$0xff] (!%p1842_p1), %v1619_v58  ;;  %v1628_v48 = vadd.f32 (!%p1842_p1), %v3650_v40, %v1580_v35  ;;  %v1592_v23 = vld [vmem:[#allocation2 + $0xf0] sm:$0xff] (!%p1842_p1) }
 0x374   : > { %1538 = vst [vmem:[#allocation2 + $0x80] sm:$0xff] %v1502_v49  ;;  %1556 = vst [vmem:[#allocation2 + $0x110] sm:$0xff] %v1520_v3  ;;  %v1575_v63 = vld [vmem:[#allocation2 + $0x68] sm:$0xff] (!%p1842_p1)  ;;  %v1622_v59 = vadd.f32 (!%p1842_p1), %v3650_v40, %v1574_v30  ;;  %v1593_v49 = vld [vmem:[#allocation2 + $0xf8] sm:$0xff] (!%p1842_p1)  ;;  %v1630_v8 = vadd.f32 (!%p1842_p1), %v3650_v40, %v1582_v55  ;;  %v1631_v15 = vadd.f32 (!%p1842_p1), %v3652_v53, %v1583_v21 }
 0x375   : > { %1539 = vst [vmem:[#allocation2 + $0x88] sm:$0xff] %v1503_v27  ;;  %1557 = vst [vmem:[#allocation2 + $0x118] sm:$0xff] %v1521_v0  ;;  %v1623_v22 = vadd.f32 (!%p1842_p1), %v3652_v53, %v1575_v63  ;;  %v1632_v27 = vadd.f32 (!%p1842_p1), %v3650_v40, %v1584_v51  ;;  %v1633_v0 = vadd.f32 (!%p1842_p1), %v3652_v53, %v1585_v29 }
 0x376   : > { %1656 = vst [vmem:[%s2631_s10 + $0x50] sm:$0xff] %v1620_v32  ;;  %1657 = vst [vmem:[%s2631_s10 + $0x58] sm:$0xff] %v1621_v61  ;;  %v1637_v5 = vadd.f32 %v3652_v53, %v1589_v25  ;;  %v1638_v7 = vadd.f32 %v3650_v40, %v1590_v24  ;;  %v1639_v20 = vadd.f32 %v3652_v53, %v1591_v10 }
 0x377   : > { %v1576_v54 = vld [vmem:[#allocation2 + $0x70] sm:$0xff]  ;;  %v1594_v3 = vld [vmem:[#allocation2 + $0x100] sm:$0xff]  ;;  %1658 = vst [vmem:[%s2631_s10 + $0x60] sm:$0xff] %v1622_v59  ;;  %1659 = vst [vmem:[%s2631_s10 + $0x68] sm:$0xff] %v1623_v22  ;;  %v1640_v13 = vadd.f32 %v3650_v40, %v1592_v23  ;;  %v1641_v44 = vadd.f32 %v3652_v53, %v1593_v49 }
 0x378   : > { %v1577_v41 = vld [vmem:[#allocation2 + $0x78] sm:$0xff]  ;;  %v1624_v19 = vadd.f32 %v3650_v40, %v1576_v54  ;;  %v1595_v31 = vld [vmem:[#allocation2 + $0x108] sm:$0xff]  ;;  %1664 = vst [vmem:[%s2631_s10 + $0x90] sm:$0xff] %v1628_v48  ;;  %1665 = vst [vmem:[%s2631_s10 + $0x98] sm:$0xff] %v1629_v46  ;;  %v1642_v56 = vadd.f32 %v3650_v40, %v1594_v3 }
 0x379   : > { %v1625_v45 = vadd.f32 %v3652_v53, %v1577_v41  ;;  %1666 = vst [vmem:[%s2631_s10 + $0xa0] sm:$0xff] %v1630_v8  ;;  %1667 = vst [vmem:[%s2631_s10 + $0xa8] sm:$0xff] %v1631_v15  ;;  %v1643_v39 = vadd.f32 %v3652_v53, %v1595_v31 }
 0x37a   : > { %1660 = vst [vmem:[%s2631_s10 + $0x70] sm:$0xff] %v1624_v19  ;;  %1668 = vst [vmem:[%s2631_s10 + $0xb0] sm:$0xff] %v1632_v27 }
 0x37b   : > { %v1578_v16 = vld [vmem:[#allocation2 + $0x80] sm:$0xff]  ;;  %1661 = vst [vmem:[%s2631_s10 + $0x78] sm:$0xff] %v1625_v45  ;;  %v1596_v11 = vld [vmem:[#allocation2 + $0x110] sm:$0xff]  ;;  %1669 = vst [vmem:[%s2631_s10 + $0xb8] sm:$0xff] %v1633_v0 }
 0x37c   : > { %v1579_v37 = vld [vmem:[#allocation2 + $0x88] sm:$0xff]  ;;  %v1626_v60 = vadd.f32 %v3650_v40, %v1578_v16  ;;  %v1597_v57 = vld [vmem:[#allocation2 + $0x118] sm:$0xff]  ;;  %1670 = vst [vmem:[%s2631_s10 + $0xc0] sm:$0xff] %v1634_v17  ;;  %1671 = vst [vmem:[%s2631_s10 + $0xc8] sm:$0xff] %v1635_v42  ;;  %v1644_v26 = vadd.f32 %v3650_v40, %v1596_v11 }
 0x37d   : > { %v1627_v33 = vadd.f32 %v3652_v53, %v1579_v37  ;;  %1672 = vst [vmem:[%s2631_s10 + $0xd0] sm:$0xff] %v1636_v50  ;;  %1673 = vst [vmem:[%s2631_s10 + $0xd8] sm:$0xff] %v1637_v5  ;;  %v1645_v36 = vadd.f32 %v3652_v53, %v1597_v57 }
 0x37e   : > { %1662 = vst [vmem:[%s2631_s10 + $0x80] sm:$0xff] %v1626_v60  ;;  %1674 = vst [vmem:[%s2631_s10 + $0xe0] sm:$0xff] %v1638_v7 }
 0x37f   : > { %1663 = vst [vmem:[%s2631_s10 + $0x88] sm:$0xff] %v1627_v33  ;;  %1675 = vst [vmem:[%s2631_s10 + $0xe8] sm:$0xff] %v1639_v20 }
 0x380   : > { %1676 = vst [vmem:[%s2631_s10 + $0xf0] sm:$0xff] %v1640_v13  ;;  %1677 = vst [vmem:[%s2631_s10 + $0xf8] sm:$0xff] %v1641_v44 }
 0x381   : > { %1678 = vst [vmem:[%s2631_s10 + $0x100] sm:$0xff] %v1642_v56  ;;  %1679 = vst [vmem:[%s2631_s10 + $0x108] sm:$0xff] %v1643_v39 }
 0x382   : > { %1680 = vst [vmem:[%s2631_s10 + $0x110] sm:$0xff] %v1644_v26  ;;  %1681 = vst [vmem:[%s2631_s10 + $0x118] sm:$0xff] %v1645_v36 }
 0x383 PF: > { %s4022_s24 = sld [smem:[#allocation18_spill]]  ;;  %s1849_s26 = sshll.u32 %s2318_s25, 8 }
 0x384   : > { %s4023_s15 = sld [smem:[#allocation67_spill]]  ;;  %s1699_s4 = sshll.u32 %s2631_s10, 4  ;;  %s3733_s4 = int_to_ptr.vmem [resolvable:$true] %s1699_s4 }
 0x385   : > { %s3737_s29 = scalar_lea.sflag [#allocation6], %s314_s30  ;;  %s2200_s28 = scalar_lea.vmem %s3733_s4, 4608 }
 0x386   : > { %p2201_p8 = scmp.ne.s32.totalorder %s3733_s4, %s2200_s28  ;;  %s2340_s25 = smov [#allocation10]  }
 0x387   : > { %s2204_s9 = sshll.u32 %s2340_s25, 4  ;;  %s2205_s9 = int_to_ptr.vmem [resolvable:$false] %s2204_s9 }
 0x388   : > { %s2206_s18 = scalar_lea.vmem %s2205_s9, 9216  ;;  %p2207_p2 = scmp.lt.s32.totalorder %s3733_s4, %s2205_s9 }
 0x389   : > { %p4024_p4 = scmp.ne.s32.totalorder %s4022_s24, 0  ;;  %p2208_p6 = scmp.lt.s32.totalorder %s2206_s18, %s2200_s28 }
 0x38a   : > { %s3730_s0 = scalar_lea.hbm %s4023_s15, %s1849_s26 }
 0x38b   : > { %p2202_p3 = pnand %p2201_p8, %p4024_p4  ;;  %p2209_p9 = por %p2208_p6, %p2207_p2 }
 0x38d   : > { %p2203_p13 = pneg %p2202_p3 }
 0x38f   : > { %p2210_p0 = pnand %p2209_p9, %p2203_p13 }
 0x391   : > { %2213 = shalt.err (!%p2210_p0)
}
 0x392   : > { %s2214_s30 = scalar_lea.hbm %s3730_s0, 4608  ;;  %s2218_s13 = scalar_lea.hbm %s4023_s15, 9216 }
 0x393   : > { %p2215_p7 = scmp.ne.s32.totalorder %s3730_s0, %s2214_s30  ;;  %p2219_p12 = scmp.lt.u32.totalorder %s3730_s0, %s4023_s15 }
 0x394   : > { %p2220_p11 = scmp.lt.u32.totalorder %s2218_s13, %s2214_s30  ;;  %p2222_p8 = scmp.lt.u32.totalorder %s2214_s30, %s3730_s0 }
 0x395   : > { %p2216_p10 = pnand %p2215_p7, %p4024_p4 }
 0x396   : > { %p2221_p1 = por %p2220_p11, %p2219_p12 }
 0x397   : > { %p2217_p5 = pneg %p2216_p10 }
 0x398   : > { %p2223_p3 = por %p2222_p8, %p2221_p1 }
 0x39a   : > { %p2224_p13 = pnand %p2223_p3, %p2217_p5 }
 0x39c   : > { %2227 = shalt.err (!%p2224_p13)
}
 0x39d   : > { %s2341_s14 = smov 256   ;;  %s2342_s2 = smov 512  }
 0x39e   : > { %s2343_s5 = smov 16  }
 0x39f   : > { %1957 = dma.vmem_to_hbm [thread:$0]  (%p4024_p4), %s3733_s4, 4608, %s3730_s0, %s3737_s29, %s2341_s14, %s2342_s2, %s2343_s5  }
 0x3a0 PF: > { %s4025_s16 = sld [smem:[#allocation17_spill]]  ;;  %s4026_s26 = sld [smem:[#allocation15_spill]] }
 0x3a1   : > { %s4027_s17 = sld [smem:[#allocation19_spill]] }
 0x3a6   : > { %p1979_p2 = scmp.ge.s32.totalorder %s4025_s16, 2  ;;  %s1714_s12 = sand.u32 1, %s4026_s26  }
 0x3a7   : > { %p4028_p6 = scmp.ne.s32.totalorder %s4027_s17, 0  ;;  %s1715_s28 = scalar_lea.sflag [#allocation6], %s1714_s12 }
 0x3a9   : > { %p1971_p9 = pnand %p1979_p2, %p4028_p6 }
 0x3ab   : > { %2285 = dma.done.wait (!%p1971_p9), %s1715_s28, 4608  }
 0x3ac   : > { %2287 = vsyncadd (!%p1971_p9), %s1715_s28, 4294962688  ;;  %s20_s28 = sadd.s32 1, %s4025_s16   ;;  %s4029_s24 = sld [smem:[#allocation16_spill]] }
 0x3ad   : > { %p17_p0 = scmp.ge.s32.totalorder %s20_s28, 6   ;;  %s4030_s26 = sld [smem:[#allocation20_spill]] }
 0x3ae   : > { %s4031_s18 = smov %s2294_s19  ;;  %s4032_s19 = smov %s2298_s20 }
 0x3af   : > { %s4033_s20 = smov %s2558_s1  ;;  %s4034_s21 = smov %s2306_s22 }
 0x3b0   : > { %s4035_s22 = smov %s2310_s23  ;;  %s4036_s23 = smov %s2563_s11 }
 0x3b1   : > { %s4037_s25 = smov %s2326_s27  ;;  %s4038_s27 = smov %s4044_s6 }
 0x3b2   :  { %19 = sbr.rel (!%p17_p0) target bundleno = 15 (0xf), region = 110 }
 0x3b9   :  { %1720 = vsyncpa [#allocation5], 1 }
 0x3ba   :  { %1722 = vsyncpa [#allocation5 + $0x1], 1 }
 0x3bb   :  { %1723 = vsyncpa [#allocation8], 1 }
 0x3bc   :  { %1724 = vsyncpa [#allocation6], 1 }
 0x3bd   :  { %1726 = vsyncpa [#allocation6 + $0x1], 1 }

</bundles_post_ra>
